<compile_context>
chip_gen: v7x
topology: tpu7x:2x2x1
jax: 0.10.0
libtpu: 0.0.40
codegen_flags: <defaults>
</compile_context>

<pallas_src>
import numpy as np
import jax
import jax.numpy as jnp
from jax.experimental import pallas as pl
from jax.experimental.pallas import tpu as pltpu


# ----------------------------- Pallas kernel --------------------------------

def _encoder_kernel(x_ref, m1_ref, s2_ref, m2_ref, s3_ref, m3_ref,
                    q1_ref, q2_ref, q3_ref, wh_ref, bh_ref, out_ref):
    f32 = jnp.float32

    def inorm_relu(acc, q_ref):
        # InstanceNorm2d(affine=False, eps=1e-5) + ReLU on (H, W*C) layout.
        # Per-channel stats = sublane mean, then the 0/1-structured
        # "channel pool & broadcast" matmul Q (K=N=128, tiny).
        q = q_ref[...]
        m = jnp.dot(jnp.mean(acc, axis=0, keepdims=True), q,
                    preferred_element_type=f32)                     # (1, W*C)
        ex2 = jnp.dot(jnp.mean(acc * acc, axis=0, keepdims=True), q,
                      preferred_element_type=f32)                   # (1, W*C)
        v = ex2 - m * m
        return jnp.maximum((acc - m) * jax.lax.rsqrt(v + 1e-5), 0.0)

    # ---- layer 1: wrapper already delivers the 5 vertical-tap slabs
    #      lane-concatenated -> a single full-depth conv matmul.
    x = x_ref[0]                                                    # (16, 640)
    y = inorm_relu(jnp.dot(x, m1_ref[...], preferred_element_type=f32),
                   q1_ref)                                          # (16, 128)

    # ---- layers 2 & 3: stride-2 vertical tap selection via tiny 0/1 matmuls,
    #      lane-concat of the 5 slabs, then one (H,640)@(640,128) conv matmul.
    def conv_layer(y_in, s_ref, m_ref, q_ref):
        slabs = [jnp.dot(s_ref[kh], y_in, preferred_element_type=f32)
                 for kh in range(5)]                                # 5 x (H_out, 128)
        slab = jnp.concatenate(slabs, axis=1)                       # (H_out, 640)
        acc = jnp.dot(slab, m_ref[...], preferred_element_type=f32) # (H_out, 128)
        return inorm_relu(acc, q_ref)

    y = conv_layer(y, s2_ref, m2_ref, q2_ref)                       # (8, 128)
    y = conv_layer(y, s3_ref, m3_ref, q3_ref)                       # (4, 128)

    # ---- AvgPool2d(4) + Flatten + fused [mu | mu | logvar] head.
    # wh already contains the pooling over W and [Wmu^T | Wmu^T | Wlv^T].
    feat = jnp.mean(y, axis=0, keepdims=True)                       # (1, 128)
    h = jnp.dot(feat, wh_ref[...], preferred_element_type=f32) + bh_ref[...]
    latent = bh_ref.shape[1] // 3
    col = jax.lax.broadcasted_iota(jnp.int32, h.shape, 1)
    # TODO(synk): stochastic reparameterization (args.stochastic=True) is not
    # implemented; deterministic path z0 = mean is used.
    out_ref[0] = jnp.where(col < latent, jnp.tanh(h), h)            # [tanh(mu), mu, lv]


# -------------------- one-time host-side parameter prep ----------------------

def _row_select(h_in, h_out):
    # S[kh, io, r] = 1 iff r == 2*io + kh - 2 and 0 <= r < h_in (vertical pad = 0 row).
    s = np.zeros((5, h_out, h_in), np.float32)
    for kh in range(5):
        for io in range(h_out):
            r = 2 * io + kh - 2
            if 0 <= r < h_in:
                s[kh, io, r] = 1.0
    return s


def _conv_matrix(w, w_in, w_out):
    # w: (cout, cin, 5, 5) torch layout.  Returns M of shape
    # (5*w_in*cin, w_out*cout) with
    #   M[(kh*w_in + jw)*cin + ci, jo*cout + co] = w[co, ci, kh, jw - 2*jo + 2]
    # for 0 <= jw - 2*jo + 2 < 5, else 0 (horizontal zero padding folded in).
    cout, cin = w.shape[0], w.shape[1]
    p = np.zeros((w_out, 5, w_in), np.float32)        # p[jo, kw, jw]
    for jo in range(w_out):
        for kw in range(5):
            jw = 2 * jo + kw - 2
            if 0 <= jw < w_in:
                p[jo, kw, jw] = 1.0
    m = np.einsum('akw,oihk->hwiao', p, w)            # (5, w_in, cin, w_out, cout)
    return np.ascontiguousarray(m.reshape(5 * w_in * cin, w_out * cout))


def _channel_pool(w_out, c_out):
    # Q[j*C+c, j'*C+c'] = 1/w_out if c == c' else 0:  per-channel mean over the
    # W axis, broadcast back to every column position.
    return np.kron(np.ones((w_out, w_out), np.float32),
                   np.eye(c_out, dtype=np.float32)) / np.float32(w_out)


def prepare_encoder_params(params, H=32):
    """Host-side, one-time conversion of the PyTorch-layout parameters into the
    matmul operands the kernel consumes (hoisted out of the per-call path)."""
    w1 = np.asarray(params["conv1_w"], np.float32)    # (nf,   z_amort, 5, 5)
    w2 = np.asarray(params["conv2_w"], np.float32)    # (2nf,  nf,      5, 5)
    w3 = np.asarray(params["conv3_w"], np.float32)    # (4nf,  2nf,     5, 5)
    wmu = np.asarray(params["mu_w"], np.float32)      # (latent, 4nf)
    bmu = np.asarray(params["mu_b"], np.float32)
    wlv = np.asarray(params["lv_w"], np.float32)
    blv = np.asarray(params["lv_b"], np.float32)
    # NOTE: conv biases b1/b2/b3 are dropped on purpose — InstanceNorm2d with
    # affine=False subtracts the per-channel mean right after, so they cancel.

    c3 = w3.shape[0]
    latent = wmu.shape[0]
    h0, h1, h2, h3 = H, H // 2, H // 4, H // 8

    # AvgPool2d(4) + Flatten folded into the fused [mu | mu | logvar] head.
    p3 = np.kron(np.ones((h3, 1), np.float32),
                 np.eye(c3, dtype=np.float32)) / np.float32(h3)      # (h3*c3, c3)
    whead = p3 @ np.concatenate([wmu.T, wmu.T, wlv.T], axis=1)       # (128, 3*latent)
    bhead = np.concatenate([bmu, bmu, blv]).reshape(1, 3 * latent)

    prep = {
        "m1": _conv_matrix(w1, h0, h1), "q1": _channel_pool(h1, w1.shape[0]),
        "s2": _row_select(h1, h2),
        "m2": _conv_matrix(w2, h1, h2), "q2": _channel_pool(h2, w2.shape[0]),
        "s3": _row_select(h2, h3),
        "m3": _conv_matrix(w3, h2, h3), "q3": _channel_pool(h3, c3),
        "wh": whead, "bh": bhead,
    }
    return {k: jnp.asarray(v) for k, v in prep.items()}


# ------------------------------- jitted forward -------------------------------

@jax.jit
def local_norm_latent_state_encoder(x, prep):
    B, _, H, W = x.shape
    assert (H, W) == (32, 32), "script is sized for 32x32 inputs"
    h1 = H // 2
    c0 = prep["m1"].shape[0] // (5 * W)              # z_amort (static)
    latent = prep["bh"].shape[1] // 3

    # x -> (B, H, W*C0) layout, vertical 5-tap stride-2 row gather, lane-concat
    # of the 5 slabs: layer 1 becomes a single in-kernel matmul (~40 KB/sample).
    x0 = x[:, :c0].astype(jnp.float32)
    x_lay = jnp.transpose(x0, (0, 2, 3, 1)).reshape(B, H, W * c0)     # (B,32,128)
    xpad = jnp.pad(x_lay, ((0, 0), (2, 2), (0, 0)))                   # (B,36,128)
    x_slab = jnp.concatenate(
        [xpad[:, kh:kh + 2 * h1 - 1:2, :] for kh in range(5)], axis=-1)  # (B,16,640)

    out = pl.pallas_call(
        _encoder_kernel,
        out_shape=jax.ShapeDtypeStruct((B, 1, 3 * latent), jnp.float32),
        grid=(B,),
        in_specs=[
            pl.BlockSpec((1, h1, x_slab.shape[-1]), lambda i: (i, 0, 0)),
            pl.BlockSpec(prep["m1"].shape, lambda i: (0, 0)),
            pl.BlockSpec(prep["s2"].shape, lambda i: (0, 0, 0)),
            pl.BlockSpec(prep["m2"].shape, lambda i: (0, 0)),
            pl.BlockSpec(prep["s3"].shape, lambda i: (0, 0, 0)),
            pl.BlockSpec(prep["m3"].shape, lambda i: (0, 0)),
            pl.BlockSpec(prep["q1"].shape, lambda i: (0, 0)),
            pl.BlockSpec(prep["q2"].shape, lambda i: (0, 0)),
            pl.BlockSpec(prep["q3"].shape, lambda i: (0, 0)),
            pl.BlockSpec(prep["wh"].shape, lambda i: (0, 0)),
            pl.BlockSpec(prep["bh"].shape, lambda i: (0, 0)),
        ],
        out_specs=pl.BlockSpec((1, 1, 3 * latent), lambda i: (i, 0, 0)),
        compiler_params=pltpu.CompilerParams(
            dimension_semantics=("parallel",)),
    )(x_slab, prep["m1"], prep["s2"], prep["m2"], prep["s3"], prep["m3"],
      prep["q1"], prep["q2"], prep["q3"], prep["wh"], prep["bh"])

    z0 = out[:, 0, :latent]
    zm = out[:, 0, latent:2 * latent]
    zl = out[:, 0, 2 * latent:]
    return z0, zm, zl


# --------------------------- pure-JAX reference ------------------------------

def reference(x, params):
    hp = jax.lax.Precision.HIGHEST
    w1, b1 = params["conv1_w"], params["conv1_b"]
    w2, b2 = params["conv2_w"], params["conv2_b"]
    w3, b3 = params["conv3_w"], params["conv3_b"]
    c0 = w1.shape[1]
    h = x[:, :c0].astype(jnp.float32)
    for w, b in ((w1, b1), (w2, b2), (w3, b3)):
        h = jax.lax.conv_general_dilated(
            h, w.astype(jnp.float32), window_strides=(2, 2),
            padding=((2, 2), (2, 2)),
            dimension_numbers=("NCHW", "OIHW", "NCHW"), precision=hp)
        h = h + b[None, :, None, None]
        m = h.mean(axis=(2, 3), keepdims=True)
        v = ((h - m) ** 2).mean(axis=(2, 3), keepdims=True)
        h = jnp.maximum((h - m) / jnp.sqrt(v + 1e-5), 0.0)
    feat = h.mean(axis=(2, 3))                      # AvgPool2d(4) on 4x4 + Flatten
    mu = jnp.matmul(feat, params["mu_w"].T, precision=hp) + params["mu_b"]
    lv = jnp.matmul(feat, params["lv_w"].T, precision=hp) + params["lv_b"]
    return jnp.tanh(mu), mu, lv


# ---------------------------------- main --------------------------------------

if __name__ == "__main__":
    # module hyper-params: z_amort=4, num_filters=8, latent_dim=16, 32x32 frames
    B, total_c, H, W = 2, 8, 32, 32         # x: [B, GenerationLen*NumChannels, H, W]
    z_amort, nf, latent = 4, 8, 16

    key = jax.random.PRNGKey(0)
    ks = jax.random.split(key, 11)
    x = jax.random.normal(ks[0], (B, total_c, H, W), jnp.float32)
    params = {
        "conv1_w": 0.2 * jax.random.normal(ks[1], (nf, z_amort, 5, 5), jnp.float32),
        "conv1_b": 0.1 * jax.random.normal(ks[2], (nf,), jnp.float32),
        "conv2_w": 0.2 * jax.random.normal(ks[3], (2 * nf, nf, 5, 5), jnp.float32),
        "conv2_b": 0.1 * jax.random.normal(ks[4], (2 * nf,), jnp.float32),
        "conv3_w": 0.2 * jax.random.normal(ks[5], (4 * nf, 2 * nf, 5, 5), jnp.float32),
        "conv3_b": 0.1 * jax.random.normal(ks[6], (4 * nf,), jnp.float32),
        "mu_w": 0.3 * jax.random.normal(ks[7], (latent, 4 * nf), jnp.float32),
        "mu_b": 0.1 * jax.random.normal(ks[8], (latent,), jnp.float32),
        "lv_w": 0.3 * jax.random.normal(ks[9], (latent, 4 * nf), jnp.float32),
        "lv_b": 0.1 * jax.random.normal(ks[10], (latent,), jnp.float32),
    }

    prep = prepare_encoder_params(params)     # one-time, hoisted out of per-call path
    z0, zm, zl = jax.block_until_ready(local_norm_latent_state_encoder(x, prep))
    r0, rm, rl = jax.block_until_ready(reference(x, params))

    ok = (z0.shape == (B, latent) and zm.shape == (B, latent)
          and zl.shape == (B, latent)
          and jnp.allclose(z0, r0, atol=1e-2, rtol=1e-2)
          and jnp.allclose(zm, rm, atol=1e-2, rtol=1e-2)
          and jnp.allclose(zl, rl, atol=1e-2, rtol=1e-2))

    print("KERNEL_OK" if ok else "KERNEL_MISMATCH")
</pallas_src>

<mosaic_0001>
module attributes {stable_mosaic.version = 11 : i64} {
  func.func @_encoder_kernel(%arg0: i32, %arg1: memref<1x16x640xf32, #tpu.memory_space<vmem>>, %arg2: memref<640x128xf32, #tpu.memory_space<vmem>>, %arg3: memref<5x8x16xf32, #tpu.memory_space<vmem>>, %arg4: memref<640x128xf32, #tpu.memory_space<vmem>>, %arg5: memref<5x4x8xf32, #tpu.memory_space<vmem>>, %arg6: memref<640x128xf32, #tpu.memory_space<vmem>>, %arg7: memref<128x128xf32, #tpu.memory_space<vmem>>, %arg8: memref<128x128xf32, #tpu.memory_space<vmem>>, %arg9: memref<128x128xf32, #tpu.memory_space<vmem>>, %arg10: memref<128x48xf32, #tpu.memory_space<vmem>>, %arg11: memref<1x48xf32, #tpu.memory_space<vmem>>, %arg12: memref<1x1x48xf32, #tpu.memory_space<vmem>>) attributes {dimension_semantics = [#tpu.dimension_semantics<parallel>], iteration_bounds = array<i64: 2>, scalar_prefetch = 0 : i64, scratch_operands = 0 : i64, tpu.core_type = #tpu.core_type<tc>, window_params = [{transform_indices = @transform_0, window_bounds = array<i64: 1, 16, 640>}, {pipeline_mode = #tpu.pipeline_mode<synchronous>, transform_indices = @transform_1, window_bounds = array<i64: 640, 128>}, {pipeline_mode = #tpu.pipeline_mode<synchronous>, transform_indices = @transform_2, window_bounds = array<i64: 5, 8, 16>}, {pipeline_mode = #tpu.pipeline_mode<synchronous>, transform_indices = @transform_3, window_bounds = array<i64: 640, 128>}, {pipeline_mode = #tpu.pipeline_mode<synchronous>, transform_indices = @transform_4, window_bounds = array<i64: 5, 4, 8>}, {pipeline_mode = #tpu.pipeline_mode<synchronous>, transform_indices = @transform_5, window_bounds = array<i64: 640, 128>}, {pipeline_mode = #tpu.pipeline_mode<synchronous>, transform_indices = @transform_6, window_bounds = array<i64: 128, 128>}, {pipeline_mode = #tpu.pipeline_mode<synchronous>, transform_indices = @transform_7, window_bounds = array<i64: 128, 128>}, {pipeline_mode = #tpu.pipeline_mode<synchronous>, transform_indices = @transform_8, window_bounds = array<i64: 128, 128>}, {pipeline_mode = #tpu.pipeline_mode<synchronous>, transform_indices = @transform_9, window_bounds = array<i64: 128, 48>}, {pipeline_mode = #tpu.pipeline_mode<synchronous>, transform_indices = @transform_10, window_bounds = array<i64: 1, 48>}, {transform_indices = @transform_11, window_bounds = array<i64: 1, 1, 48>}]} {
    %c0 = arith.constant 0 : index
    %c0_0 = arith.constant 0 : index
    %c0_1 = arith.constant 0 : index
    %0 = vector.load %arg1[%c0, %c0_0, %c0_1] : memref<1x16x640xf32, #tpu.memory_space<vmem>>, vector<1x16x640xf32>
    %1 = vector.shape_cast %0 : vector<1x16x640xf32> to vector<16x640xf32>
    %c0_2 = arith.constant 0 : index
    %c0_3 = arith.constant 0 : index
    %2 = vector.load %arg2[%c0_2, %c0_3] : memref<640x128xf32, #tpu.memory_space<vmem>>, vector<640x128xf32>
    %cst = arith.constant dense<0.000000e+00> : vector<16x128xf32>
    %3 = tpu.matmul %1, %2, %cst {dimension_numbers = #tpu.dot_dimension_numbers<[1], [0], [0], [1], [0, 0, 1, 1], [], []>} : vector<16x640xf32>, vector<640x128xf32>, vector<16x128xf32> -> vector<16x128xf32>
    %c0_4 = arith.constant 0 : index
    %c0_5 = arith.constant 0 : index
    %4 = vector.load %arg7[%c0_4, %c0_5] : memref<128x128xf32, #tpu.memory_space<vmem>>, vector<128x128xf32>
    %cst_6 = arith.constant dense<0.000000e+00> : vector<128xf32>
    %5 = vector.multi_reduction <add>, %3, %cst_6 [0] : vector<16x128xf32> to vector<128xf32>
    %6 = vector.shape_cast %5 : vector<128xf32> to vector<1x128xf32>
    %cst_7 = arith.constant 1.600000e+01 : f32
    %7 = vector.broadcast %cst_7 : f32 to vector<1x128xf32>
    %8 = arith.divf %6, %7 : vector<1x128xf32>
    %cst_8 = arith.constant dense<0.000000e+00> : vector<1x128xf32>
    %9 = tpu.matmul %8, %4, %cst_8 {dimension_numbers = #tpu.dot_dimension_numbers<[1], [0], [0], [1], [0, 0, 1, 1], [], []>} : vector<1x128xf32>, vector<128x128xf32>, vector<1x128xf32> -> vector<1x128xf32>
    %10 = arith.mulf %3, %3 : vector<16x128xf32>
    %cst_9 = arith.constant dense<0.000000e+00> : vector<128xf32>
    %11 = vector.multi_reduction <add>, %10, %cst_9 [0] : vector<16x128xf32> to vector<128xf32>
    %12 = vector.shape_cast %11 : vector<128xf32> to vector<1x128xf32>
    %cst_10 = arith.constant 1.600000e+01 : f32
    %13 = vector.broadcast %cst_10 : f32 to vector<1x128xf32>
    %14 = arith.divf %12, %13 : vector<1x128xf32>
    %cst_11 = arith.constant dense<0.000000e+00> : vector<1x128xf32>
    %15 = tpu.matmul %14, %4, %cst_11 {dimension_numbers = #tpu.dot_dimension_numbers<[1], [0], [0], [1], [0, 0, 1, 1], [], []>} : vector<1x128xf32>, vector<128x128xf32>, vector<1x128xf32> -> vector<1x128xf32>
    %16 = arith.mulf %9, %9 : vector<1x128xf32>
    %17 = arith.subf %15, %16 : vector<1x128xf32>
    %18 = vector.broadcast %9 : vector<1x128xf32> to vector<16x128xf32>
    %19 = arith.subf %3, %18 : vector<16x128xf32>
    %cst_12 = arith.constant 9.99999974E-6 : f32
    %20 = vector.broadcast %cst_12 : f32 to vector<1x128xf32>
    %21 = arith.addf %17, %20 : vector<1x128xf32>
    %22 = math.rsqrt %21 : vector<1x128xf32>
    %23 = vector.broadcast %22 : vector<1x128xf32> to vector<16x128xf32>
    %24 = arith.mulf %19, %23 : vector<16x128xf32>
    %cst_13 = arith.constant 0.000000e+00 : f32
    %25 = vector.broadcast %cst_13 : f32 to vector<16x128xf32>
    %26 = arith.maximumf %24, %25 : vector<16x128xf32>
    %c0_14 = arith.constant 0 : index
    %c0_15 = arith.constant 0 : index
    %c0_16 = arith.constant 0 : index
    %27 = vector.load %arg3[%c0_14, %c0_15, %c0_16] : memref<5x8x16xf32, #tpu.memory_space<vmem>>, vector<1x8x16xf32>
    %28 = vector.shape_cast %27 : vector<1x8x16xf32> to vector<8x16xf32>
    %cst_17 = arith.constant dense<0.000000e+00> : vector<8x128xf32>
    %29 = tpu.matmul %28, %26, %cst_17 {dimension_numbers = #tpu.dot_dimension_numbers<[1], [0], [0], [1], [0, 0, 1, 1], [], []>} : vector<8x16xf32>, vector<16x128xf32>, vector<8x128xf32> -> vector<8x128xf32>
    %c1 = arith.constant 1 : index
    %c0_18 = arith.constant 0 : index
    %c0_19 = arith.constant 0 : index
    %30 = vector.load %arg3[%c1, %c0_18, %c0_19] : memref<5x8x16xf32, #tpu.memory_space<vmem>>, vector<1x8x16xf32>
    %31 = vector.shape_cast %30 : vector<1x8x16xf32> to vector<8x16xf32>
    %cst_20 = arith.constant dense<0.000000e+00> : vector<8x128xf32>
    %32 = tpu.matmul %31, %26, %cst_20 {dimension_numbers = #tpu.dot_dimension_numbers<[1], [0], [0], [1], [0, 0, 1, 1], [], []>} : vector<8x16xf32>, vector<16x128xf32>, vector<8x128xf32> -> vector<8x128xf32>
    %c2 = arith.constant 2 : index
    %c0_21 = arith.constant 0 : index
    %c0_22 = arith.constant 0 : index
    %33 = vector.load %arg3[%c2, %c0_21, %c0_22] : memref<5x8x16xf32, #tpu.memory_space<vmem>>, vector<1x8x16xf32>
    %34 = vector.shape_cast %33 : vector<1x8x16xf32> to vector<8x16xf32>
    %cst_23 = arith.constant dense<0.000000e+00> : vector<8x128xf32>
    %35 = tpu.matmul %34, %26, %cst_23 {dimension_numbers = #tpu.dot_dimension_numbers<[1], [0], [0], [1], [0, 0, 1, 1], [], []>} : vector<8x16xf32>, vector<16x128xf32>, vector<8x128xf32> -> vector<8x128xf32>
    %c3 = arith.constant 3 : index
    %c0_24 = arith.constant 0 : index
    %c0_25 = arith.constant 0 : index
    %36 = vector.load %arg3[%c3, %c0_24, %c0_25] : memref<5x8x16xf32, #tpu.memory_space<vmem>>, vector<1x8x16xf32>
    %37 = vector.shape_cast %36 : vector<1x8x16xf32> to vector<8x16xf32>
    %cst_26 = arith.constant dense<0.000000e+00> : vector<8x128xf32>
    %38 = tpu.matmul %37, %26, %cst_26 {dimension_numbers = #tpu.dot_dimension_numbers<[1], [0], [0], [1], [0, 0, 1, 1], [], []>} : vector<8x16xf32>, vector<16x128xf32>, vector<8x128xf32> -> vector<8x128xf32>
    %c4 = arith.constant 4 : index
    %c0_27 = arith.constant 0 : index
    %c0_28 = arith.constant 0 : index
    %39 = vector.load %arg3[%c4, %c0_27, %c0_28] : memref<5x8x16xf32, #tpu.memory_space<vmem>>, vector<1x8x16xf32>
    %40 = vector.shape_cast %39 : vector<1x8x16xf32> to vector<8x16xf32>
    %cst_29 = arith.constant dense<0.000000e+00> : vector<8x128xf32>
    %41 = tpu.matmul %40, %26, %cst_29 {dimension_numbers = #tpu.dot_dimension_numbers<[1], [0], [0], [1], [0, 0, 1, 1], [], []>} : vector<8x16xf32>, vector<16x128xf32>, vector<8x128xf32> -> vector<8x128xf32>
    %42 = tpu.concatenate %29, %32, %35, %38, %41 in 1 : vector<8x128xf32>, vector<8x128xf32>, vector<8x128xf32>, vector<8x128xf32>, vector<8x128xf32> -> vector<8x640xf32>
    %c0_30 = arith.constant 0 : index
    %c0_31 = arith.constant 0 : index
    %43 = vector.load %arg4[%c0_30, %c0_31] : memref<640x128xf32, #tpu.memory_space<vmem>>, vector<640x128xf32>
    %cst_32 = arith.constant dense<0.000000e+00> : vector<8x128xf32>
    %44 = tpu.matmul %42, %43, %cst_32 {dimension_numbers = #tpu.dot_dimension_numbers<[1], [0], [0], [1], [0, 0, 1, 1], [], []>} : vector<8x640xf32>, vector<640x128xf32>, vector<8x128xf32> -> vector<8x128xf32>
    %c0_33 = arith.constant 0 : index
    %c0_34 = arith.constant 0 : index
    %45 = vector.load %arg8[%c0_33, %c0_34] : memref<128x128xf32, #tpu.memory_space<vmem>>, vector<128x128xf32>
    %cst_35 = arith.constant dense<0.000000e+00> : vector<128xf32>
    %46 = vector.multi_reduction <add>, %44, %cst_35 [0] : vector<8x128xf32> to vector<128xf32>
    %47 = vector.shape_cast %46 : vector<128xf32> to vector<1x128xf32>
    %cst_36 = arith.constant 8.000000e+00 : f32
    %48 = vector.broadcast %cst_36 : f32 to vector<1x128xf32>
    %49 = arith.divf %47, %48 : vector<1x128xf32>
    %cst_37 = arith.constant dense<0.000000e+00> : vector<1x128xf32>
    %50 = tpu.matmul %49, %45, %cst_37 {dimension_numbers = #tpu.dot_dimension_numbers<[1], [0], [0], [1], [0, 0, 1, 1], [], []>} : vector<1x128xf32>, vector<128x128xf32>, vector<1x128xf32> -> vector<1x128xf32>
    %51 = arith.mulf %44, %44 : vector<8x128xf32>
    %cst_38 = arith.constant dense<0.000000e+00> : vector<128xf32>
    %52 = vector.multi_reduction <add>, %51, %cst_38 [0] : vector<8x128xf32> to vector<128xf32>
    %53 = vector.shape_cast %52 : vector<128xf32> to vector<1x128xf32>
    %cst_39 = arith.constant 8.000000e+00 : f32
    %54 = vector.broadcast %cst_39 : f32 to vector<1x128xf32>
    %55 = arith.divf %53, %54 : vector<1x128xf32>
    %cst_40 = arith.constant dense<0.000000e+00> : vector<1x128xf32>
    %56 = tpu.matmul %55, %45, %cst_40 {dimension_numbers = #tpu.dot_dimension_numbers<[1], [0], [0], [1], [0, 0, 1, 1], [], []>} : vector<1x128xf32>, vector<128x128xf32>, vector<1x128xf32> -> vector<1x128xf32>
    %57 = arith.mulf %50, %50 : vector<1x128xf32>
    %58 = arith.subf %56, %57 : vector<1x128xf32>
    %59 = vector.broadcast %50 : vector<1x128xf32> to vector<8x128xf32>
    %60 = arith.subf %44, %59 : vector<8x128xf32>
    %cst_41 = arith.constant 9.99999974E-6 : f32
    %61 = vector.broadcast %cst_41 : f32 to vector<1x128xf32>
    %62 = arith.addf %58, %61 : vector<1x128xf32>
    %63 = math.rsqrt %62 : vector<1x128xf32>
    %64 = vector.broadcast %63 : vector<1x128xf32> to vector<8x128xf32>
    %65 = arith.mulf %60, %64 : vector<8x128xf32>
    %cst_42 = arith.constant 0.000000e+00 : f32
    %66 = vector.broadcast %cst_42 : f32 to vector<8x128xf32>
    %67 = arith.maximumf %65, %66 : vector<8x128xf32>
    %c0_43 = arith.constant 0 : index
    %c0_44 = arith.constant 0 : index
    %c0_45 = arith.constant 0 : index
    %68 = vector.load %arg5[%c0_43, %c0_44, %c0_45] : memref<5x4x8xf32, #tpu.memory_space<vmem>>, vector<1x4x8xf32>
    %69 = vector.shape_cast %68 : vector<1x4x8xf32> to vector<4x8xf32>
    %cst_46 = arith.constant dense<0.000000e+00> : vector<4x128xf32>
    %70 = tpu.matmul %69, %67, %cst_46 {dimension_numbers = #tpu.dot_dimension_numbers<[1], [0], [0], [1], [0, 0, 1, 1], [], []>} : vector<4x8xf32>, vector<8x128xf32>, vector<4x128xf32> -> vector<4x128xf32>
    %c1_47 = arith.constant 1 : index
    %c0_48 = arith.constant 0 : index
    %c0_49 = arith.constant 0 : index
    %71 = vector.load %arg5[%c1_47, %c0_48, %c0_49] : memref<5x4x8xf32, #tpu.memory_space<vmem>>, vector<1x4x8xf32>
    %72 = vector.shape_cast %71 : vector<1x4x8xf32> to vector<4x8xf32>
    %cst_50 = arith.constant dense<0.000000e+00> : vector<4x128xf32>
    %73 = tpu.matmul %72, %67, %cst_50 {dimension_numbers = #tpu.dot_dimension_numbers<[1], [0], [0], [1], [0, 0, 1, 1], [], []>} : vector<4x8xf32>, vector<8x128xf32>, vector<4x128xf32> -> vector<4x128xf32>
    %c2_51 = arith.constant 2 : index
    %c0_52 = arith.constant 0 : index
    %c0_53 = arith.constant 0 : index
    %74 = vector.load %arg5[%c2_51, %c0_52, %c0_53] : memref<5x4x8xf32, #tpu.memory_space<vmem>>, vector<1x4x8xf32>
    %75 = vector.shape_cast %74 : vector<1x4x8xf32> to vector<4x8xf32>
    %cst_54 = arith.constant dense<0.000000e+00> : vector<4x128xf32>
    %76 = tpu.matmul %75, %67, %cst_54 {dimension_numbers = #tpu.dot_dimension_numbers<[1], [0], [0], [1], [0, 0, 1, 1], [], []>} : vector<4x8xf32>, vector<8x128xf32>, vector<4x128xf32> -> vector<4x128xf32>
    %c3_55 = arith.constant 3 : index
    %c0_56 = arith.constant 0 : index
    %c0_57 = arith.constant 0 : index
    %77 = vector.load %arg5[%c3_55, %c0_56, %c0_57] : memref<5x4x8xf32, #tpu.memory_space<vmem>>, vector<1x4x8xf32>
    %78 = vector.shape_cast %77 : vector<1x4x8xf32> to vector<4x8xf32>
    %cst_58 = arith.constant dense<0.000000e+00> : vector<4x128xf32>
    %79 = tpu.matmul %78, %67, %cst_58 {dimension_numbers = #tpu.dot_dimension_numbers<[1], [0], [0], [1], [0, 0, 1, 1], [], []>} : vector<4x8xf32>, vector<8x128xf32>, vector<4x128xf32> -> vector<4x128xf32>
    %c4_59 = arith.constant 4 : index
    %c0_60 = arith.constant 0 : index
    %c0_61 = arith.constant 0 : index
    %80 = vector.load %arg5[%c4_59, %c0_60, %c0_61] : memref<5x4x8xf32, #tpu.memory_space<vmem>>, vector<1x4x8xf32>
    %81 = vector.shape_cast %80 : vector<1x4x8xf32> to vector<4x8xf32>
    %cst_62 = arith.constant dense<0.000000e+00> : vector<4x128xf32>
    %82 = tpu.matmul %81, %67, %cst_62 {dimension_numbers = #tpu.dot_dimension_numbers<[1], [0], [0], [1], [0, 0, 1, 1], [], []>} : vector<4x8xf32>, vector<8x128xf32>, vector<4x128xf32> -> vector<4x128xf32>
    %83 = tpu.concatenate %70, %73, %76, %79, %82 in 1 : vector<4x128xf32>, vector<4x128xf32>, vector<4x128xf32>, vector<4x128xf32>, vector<4x128xf32> -> vector<4x640xf32>
    %c0_63 = arith.constant 0 : index
    %c0_64 = arith.constant 0 : index
    %84 = vector.load %arg6[%c0_63, %c0_64] : memref<640x128xf32, #tpu.memory_space<vmem>>, vector<640x128xf32>
    %cst_65 = arith.constant dense<0.000000e+00> : vector<4x128xf32>
    %85 = tpu.matmul %83, %84, %cst_65 {dimension_numbers = #tpu.dot_dimension_numbers<[1], [0], [0], [1], [0, 0, 1, 1], [], []>} : vector<4x640xf32>, vector<640x128xf32>, vector<4x128xf32> -> vector<4x128xf32>
    %c0_66 = arith.constant 0 : index
    %c0_67 = arith.constant 0 : index
    %86 = vector.load %arg9[%c0_66, %c0_67] : memref<128x128xf32, #tpu.memory_space<vmem>>, vector<128x128xf32>
    %cst_68 = arith.constant dense<0.000000e+00> : vector<128xf32>
    %87 = vector.multi_reduction <add>, %85, %cst_68 [0] : vector<4x128xf32> to vector<128xf32>
    %88 = vector.shape_cast %87 : vector<128xf32> to vector<1x128xf32>
    %cst_69 = arith.constant 4.000000e+00 : f32
    %89 = vector.broadcast %cst_69 : f32 to vector<1x128xf32>
    %90 = arith.divf %88, %89 : vector<1x128xf32>
    %cst_70 = arith.constant dense<0.000000e+00> : vector<1x128xf32>
    %91 = tpu.matmul %90, %86, %cst_70 {dimension_numbers = #tpu.dot_dimension_numbers<[1], [0], [0], [1], [0, 0, 1, 1], [], []>} : vector<1x128xf32>, vector<128x128xf32>, vector<1x128xf32> -> vector<1x128xf32>
    %92 = arith.mulf %85, %85 : vector<4x128xf32>
    %cst_71 = arith.constant dense<0.000000e+00> : vector<128xf32>
    %93 = vector.multi_reduction <add>, %92, %cst_71 [0] : vector<4x128xf32> to vector<128xf32>
    %94 = vector.shape_cast %93 : vector<128xf32> to vector<1x128xf32>
    %cst_72 = arith.constant 4.000000e+00 : f32
    %95 = vector.broadcast %cst_72 : f32 to vector<1x128xf32>
    %96 = arith.divf %94, %95 : vector<1x128xf32>
    %cst_73 = arith.constant dense<0.000000e+00> : vector<1x128xf32>
    %97 = tpu.matmul %96, %86, %cst_73 {dimension_numbers = #tpu.dot_dimension_numbers<[1], [0], [0], [1], [0, 0, 1, 1], [], []>} : vector<1x128xf32>, vector<128x128xf32>, vector<1x128xf32> -> vector<1x128xf32>
    %98 = arith.mulf %91, %91 : vector<1x128xf32>
    %99 = arith.subf %97, %98 : vector<1x128xf32>
    %100 = vector.broadcast %91 : vector<1x128xf32> to vector<4x128xf32>
    %101 = arith.subf %85, %100 : vector<4x128xf32>
    %cst_74 = arith.constant 9.99999974E-6 : f32
    %102 = vector.broadcast %cst_74 : f32 to vector<1x128xf32>
    %103 = arith.addf %99, %102 : vector<1x128xf32>
    %104 = math.rsqrt %103 : vector<1x128xf32>
    %105 = vector.broadcast %104 : vector<1x128xf32> to vector<4x128xf32>
    %106 = arith.mulf %101, %105 : vector<4x128xf32>
    %cst_75 = arith.constant 0.000000e+00 : f32
    %107 = vector.broadcast %cst_75 : f32 to vector<4x128xf32>
    %108 = arith.maximumf %106, %107 : vector<4x128xf32>
    %cst_76 = arith.constant dense<0.000000e+00> : vector<128xf32>
    %109 = vector.multi_reduction <add>, %108, %cst_76 [0] : vector<4x128xf32> to vector<128xf32>
    %110 = vector.shape_cast %109 : vector<128xf32> to vector<1x128xf32>
    %cst_77 = arith.constant 4.000000e+00 : f32
    %111 = vector.broadcast %cst_77 : f32 to vector<1x128xf32>
    %112 = arith.divf %110, %111 : vector<1x128xf32>
    %c0_78 = arith.constant 0 : index
    %c0_79 = arith.constant 0 : index
    %113 = vector.load %arg10[%c0_78, %c0_79] : memref<128x48xf32, #tpu.memory_space<vmem>>, vector<128x48xf32>
    %cst_80 = arith.constant dense<0.000000e+00> : vector<1x48xf32>
    %114 = tpu.matmul %112, %113, %cst_80 {dimension_numbers = #tpu.dot_dimension_numbers<[1], [0], [0], [1], [0, 0, 1, 1], [], []>} : vector<1x128xf32>, vector<128x48xf32>, vector<1x48xf32> -> vector<1x48xf32>
    %c0_81 = arith.constant 0 : index
    %c0_82 = arith.constant 0 : index
    %115 = vector.load %arg11[%c0_81, %c0_82] : memref<1x48xf32, #tpu.memory_space<vmem>>, vector<1x48xf32>
    %116 = arith.addf %114, %115 : vector<1x48xf32>
    %117 = tpu.iota {dimensions = array<i32: 1>} : vector<1x48xi32>
    %c16_i32 = arith.constant 16 : i32
    %118 = vector.broadcast %c16_i32 : i32 to vector<1x48xi32>
    %119 = arith.cmpi slt, %117, %118 : vector<1x48xi32>
    %120 = math.tanh %116 : vector<1x48xf32>
    %121 = arith.select %119, %120, %116 : vector<1x48xi1>, vector<1x48xf32>
    %c0_83 = arith.constant 0 : index
    %c0_84 = arith.constant 0 : index
    %c0_85 = arith.constant 0 : index
    %122 = vector.load %arg12[%c0_83, %c0_84, %c0_85] : memref<1x1x48xf32, #tpu.memory_space<vmem>>, vector<1x1x48xf32>
    %123 = vector.shape_cast %122 : vector<1x1x48xf32> to vector<1x48xf32>
    %124 = vector.shape_cast %121 : vector<1x48xf32> to vector<1x1x48xf32>
    tpu.vector_store %arg12[%c0_83, %c0_84, %c0_85], %124 {strides = array<i32>} : memref<1x1x48xf32, #tpu.memory_space<vmem>>, vector<1x1x48xf32>,
    return
  }
  func.func @transform_0(%arg0: i32) -> (i32, i32, i32) {
    %c0_i32 = arith.constant 0 : i32
    %c0_i32_0 = arith.constant 0 : i32
    %c0_i32_1 = arith.constant 0 : i32
    return %arg0, %c0_i32, %c0_i32_0 : i32, i32, i32
  }
  func.func @transform_1(%arg0: i32) -> (i32, i32) {
    %c0_i32 = arith.constant 0 : i32
    %c0_i32_0 = arith.constant 0 : i32
    %c0_i32_1 = arith.constant 0 : i32
    return %c0_i32, %c0_i32_0 : i32, i32
  }
  func.func @transform_2(%arg0: i32) -> (i32, i32, i32) {
    %c0_i32 = arith.constant 0 : i32
    %c0_i32_0 = arith.constant 0 : i32
    %c0_i32_1 = arith.constant 0 : i32
    %c0_i32_2 = arith.constant 0 : i32
    return %c0_i32, %c0_i32_0, %c0_i32_1 : i32, i32, i32
  }
  func.func @transform_3(%arg0: i32) -> (i32, i32) {
    %c0_i32 = arith.constant 0 : i32
    %c0_i32_0 = arith.constant 0 : i32
    %c0_i32_1 = arith.constant 0 : i32
    return %c0_i32, %c0_i32_0 : i32, i32
  }
  func.func @transform_4(%arg0: i32) -> (i32, i32, i32) {
    %c0_i32 = arith.constant 0 : i32
    %c0_i32_0 = arith.constant 0 : i32
    %c0_i32_1 = arith.constant 0 : i32
    %c0_i32_2 = arith.constant 0 : i32
    return %c0_i32, %c0_i32_0, %c0_i32_1 : i32, i32, i32
  }
  func.func @transform_5(%arg0: i32) -> (i32, i32) {
    %c0_i32 = arith.constant 0 : i32
    %c0_i32_0 = arith.constant 0 : i32
    %c0_i32_1 = arith.constant 0 : i32
    return %c0_i32, %c0_i32_0 : i32, i32
  }
  func.func @transform_6(%arg0: i32) -> (i32, i32) {
    %c0_i32 = arith.constant 0 : i32
    %c0_i32_0 = arith.constant 0 : i32
    %c0_i32_1 = arith.constant 0 : i32
    return %c0_i32, %c0_i32_0 : i32, i32
  }
  func.func @transform_7(%arg0: i32) -> (i32, i32) {
    %c0_i32 = arith.constant 0 : i32
    %c0_i32_0 = arith.constant 0 : i32
    %c0_i32_1 = arith.constant 0 : i32
    return %c0_i32, %c0_i32_0 : i32, i32
  }
  func.func @transform_8(%arg0: i32) -> (i32, i32) {
    %c0_i32 = arith.constant 0 : i32
    %c0_i32_0 = arith.constant 0 : i32
    %c0_i32_1 = arith.constant 0 : i32
    return %c0_i32, %c0_i32_0 : i32, i32
  }
  func.func @transform_9(%arg0: i32) -> (i32, i32) {
    %c0_i32 = arith.constant 0 : i32
    %c0_i32_0 = arith.constant 0 : i32
    %c0_i32_1 = arith.constant 0 : i32
    return %c0_i32, %c0_i32_0 : i32, i32
  }
  func.func @transform_10(%arg0: i32) -> (i32, i32) {
    %c0_i32 = arith.constant 0 : i32
    %c0_i32_0 = arith.constant 0 : i32
    %c0_i32_1 = arith.constant 0 : i32
    return %c0_i32, %c0_i32_0 : i32, i32
  }
  func.func @transform_11(%arg0: i32) -> (i32, i32, i32) {
    %c0_i32 = arith.constant 0 : i32
    %c0_i32_0 = arith.constant 0 : i32
    %c0_i32_1 = arith.constant 0 : i32
    return %arg0, %c0_i32, %c0_i32_0 : i32, i32, i32
  }
}

</mosaic_0001>

<bundles_post_ra>
// kernel: local_norm_latent_state_encoder.1
= control target key start
LH: loop header
LB: loop body
LE: loop exit
PB: predicated region body
PF: predicated region fallthrough
CT: control target
= control target key end

     0   :  { %16 = vsyncpa [#allocation3], 0  ;;  %s5478_s0 = inlined_call_operand.vmem [shape: f32[2,16,640], index: 0, kind: input, shape index: {}]   ;;  %s5479_s1 = inlined_call_operand.vmem [shape: f32[640,128], index: 1, kind: input, shape index: {}]   ;;  %s5480_s2 = inlined_call_operand.hbm [shape: f32[5,8,16], index: 2, kind: input, shape index: {}]   ;;  %s5481_s3 = inlined_call_operand.vmem [shape: f32[640,128], index: 3, kind: input, shape index: {}]   ;;  %s5482_s4 = inlined_call_operand.hbm [shape: f32[5,4,8], index: 4, kind: input, shape index: {}]   ;;  %s5483_s5 = inlined_call_operand.vmem [shape: f32[640,128], index: 5, kind: input, shape index: {}]   ;;  %s5484_s6 = inlined_call_operand.vmem [shape: f32[128,128], index: 6, kind: input, shape index: {}]   ;;  %s5485_s7 = inlined_call_operand.vmem [shape: f32[128,128], index: 7, kind: input, shape index: {}]   ;;  %s5486_s8 = inlined_call_operand.vmem [shape: f32[128,128], index: 8, kind: input, shape index: {}]   ;;  %s5487_s9 = inlined_call_operand.vmem [shape: f32[128,48], index: 9, kind: input, shape index: {}]   ;;  %s5488_s10 = inlined_call_operand.vmem [shape: f32[1,48], index: 10, kind: input, shape index: {}]   ;;  %s5489_s11 = inlined_call_operand.vmem [shape: f32[2,1,48], index: 11, kind: output, shape index: {}]  }
   0x1   :  { %17 = vsyncpa [#allocation5], 0  ;;  %s4284_s17 = smov 0  }
   0x2 LB: > { %s4215_s18 = smov [#allocation2]   ;;  %s4290_s20 = sadd.s32 4294967295, %s4213_s17   ;;  %s4213_s17 = sphi %s4284_s17, %s23_s17  }
   0x3   : > { %s305_s19 = sshll.u32 %s4215_s18, 4  ;;  %p2801_p0 = scmp.ge.s32.totalorder %s4213_s17, 1  ;;  %s306_s19 = int_to_ptr.vmem [resolvable:$true] %s305_s19 }
   0x4   : > { %p290_p1 = scmp.lt.s32.totalorder %s4213_s17, 3  ;;  %p5490_p3 = scmp.eq.s32.totalorder %s4290_s20, 0 }
   0x5   : > { %s4216_s22 = smov [#allocation4]   ;;  %s4143_s27 = scalar_lea.hbm %s5480_s2, 640 }
   0x6   : > { %p4294_p2 = pnand %p2801_p0, %p290_p1  ;;  %s321_s23 = sshll.u32 %s4216_s22, 4  ;;  %s4307_s23 = int_to_ptr.vmem [resolvable:$true] %s321_s23 }
   0x7   : > { %p4144_p6 = scmp.ne.s32.totalorder %s5480_s2, %s4143_s27  ;;  %p4150_p10 = scmp.lt.u32.totalorder %s4143_s27, %s5480_s2 }
   0x8   : > { %s5492_s21 = scalar_select %p4294_p2, 1, 0 }
   0x9   : > { %p4107_p4 = pneg %p4294_p2 }
   0xb   : > { %p4303_p5 = pnand %p5490_p3, %p4107_p4 }
   0xd   : > { %p4145_p7 = pneg %p4303_p5 }
   0xf   : > { %p4146_p8 = pnand %p4145_p7, %p4144_p6 }
  0x11   : > { %p4147_p9 = pneg %p4146_p8 }
  0x13   : > { %p4152_p11 = pnand %p4150_p10, %p4147_p9 }
  0x15   : > { %4155 = shalt.err (!%p4152_p11)
}
  0x16   : > { %s4156_s13 = scalar_lea.vmem %s306_s19, 640  ;;  %p4164_p1 = scmp.lt.s32.totalorder %s306_s19, %s306_s19 }
  0x17   : > { %p4157_p12 = scmp.ne.s32.totalorder %s306_s19, %s4156_s13  ;;  %p4165_p4 = scmp.lt.s32.totalorder %s4156_s13, %s4156_s13 }
  0x19   : > { %p4159_p13 = pnand %p4157_p12, %p4145_p7  ;;  %p4166_p3 = por %p4165_p4, %p4164_p1 }
  0x1b   : > { %p4160_p0 = pneg %p4159_p13 }
  0x1d   : > { %p4167_p2 = pnand %p4166_p3, %p4160_p0 }
  0x1f   : > { %4170 = shalt.err (!%p4167_p2)
}
  0x20   : > { %s4217_s14 = smov 128   ;;  %s4218_s15 = smov 8  }
  0x21   : > { %4110 = dma.hbm_to_vmem [thread:$0]  (!%p4303_p5), %s5480_s2, 640, %s306_s19, [#allocation3], %s4217_s14, %s4217_s14, %s4218_s15  }
  0x22   : > { %s4171_s26 = scalar_lea.hbm %s5482_s4, 320 }
  0x23   : > { %p4172_p6 = scmp.ne.s32.totalorder %s5482_s4, %s4171_s26  ;;  %p4178_p8 = scmp.lt.u32.totalorder %s4171_s26, %s5482_s4 }
  0x25   : > { %p4174_p2 = pnand %p4172_p6, %p4145_p7 }
  0x27   : > { %p4175_p3 = pneg %p4174_p2 }
  0x29   : > { %p4180_p9 = pnand %p4178_p8, %p4175_p3 }
  0x2b   : > { %4183 = shalt.err (!%p4180_p9)
}
  0x2c   : > { %s4184_s19 = scalar_lea.vmem %s4307_s23, 320  ;;  %p4192_p13 = scmp.lt.s32.totalorder %s4307_s23, %s4307_s23 }
  0x2d   : > { %p4185_p10 = scmp.ne.s32.totalorder %s4307_s23, %s4184_s19  ;;  %p4193_p0 = scmp.lt.s32.totalorder %s4184_s19, %s4184_s19 }
  0x2f   : > { %p4187_p11 = pnand %p4185_p10, %p4145_p7  ;;  %p4194_p1 = por %p4193_p0, %p4192_p13 }
  0x31   : > { %p4188_p12 = pneg %p4187_p11 }
  0x33   : > { %p4195_p4 = pnand %p4194_p1, %p4188_p12 }
  0x35   : > { %4198 = shalt.err (!%p4195_p4)
}
  0x36   : > { %s4219_s12 = smov 64   ;;  %s4220_s13 = smov 4  }
  0x37   : > { %4113 = dma.hbm_to_vmem [thread:$0]  (!%p4303_p5), %s5482_s4, 320, %s4307_s23, [#allocation5], %s4219_s12, %s4219_s12, %s4220_s13  }
  0x38   : > { %p5494_p6 = scmp.ne.s32.totalorder %s5492_s21, 0 }
  0x39   : > { %p5495_p7 = scmp.eq.s32.totalorder (!%p5494_p6), %s4290_s20, 0 }
  0x3a   : > { %363 = sbr.rel (%p5494_p6) target bundleno = 2277 (0x8e5), region = 64 }
  0x41   : > { %4204 = dma.done.wait (%p5495_p7), [#allocation3], 640   ;;  %p5496_p2 = pmov %p5495_p7 }
  0x43   : > { %4206 = vsyncadd (%p5496_p2), [#allocation3], 4294966656  ;;  %p5497_p3 = pmov %p5496_p2 }
  0x44   : > { %p5498_p8 = pmov %p5496_p2 }
  0x45   : > { %4208 = dma.done.wait (%p5497_p3), [#allocation5], 320  }
  0x46   : > { %4210 = vsyncadd (%p5498_p8), [#allocation5], 4294966976  ;;  %v439_v0 = vld [vmem:[%s5479_s1 + $0x80] sm:$0xff]  ;;  %v440_v1 = vld [vmem:[%s5479_s1 + $0x88] sm:$0xff]  ;;  %p405_p5 = scmp.lt.s32.totalorder %s4290_s20, 1  ;;  %vm4222_vm0 = vmmov 0  }
  0x47   : > { %v471_v2 = vld [vmem:[%s5479_s1 + $0x180] sm:$0xff]  ;;  %v3643_v3 = vpack.c.bf16 %v440_v1, %v439_v0  ;;  %v472_v4 = vld [vmem:[%s5479_s1 + $0x188] sm:$0xff]  ;;  %v441_v11 = vld [vmem:[%s5479_s1 + $0x90] sm:$0xff]  ;;  %vm922_vm1 = vcmask 130048   ;;  %vm1774_vm2 = vcmask 64512   ;;  %vm2454_vm3 = vcmask 1043456  }
  0x48   : > { %v423_v5 = vld [vmem:[%s5479_s1] sm:$0xff]  ;;  %v424_v6 = vld [vmem:[%s5479_s1 + $0x8] sm:$0xff]  ;;  %v3675_v7 = vpack.c.bf16 %v472_v4, %v471_v2  ;;  %v442_v13 = vld [vmem:[%s5479_s1 + $0x98] sm:$0xff]  ;;  %s5500_s20 = smov (!%p405_p5, %s4290_s20), 1  ;;  %vm2728_vm5 = vcmask 385024  }
  0x49   : > { %v3645_v8 = vpack.c.bf16 %v424_v6, %v423_v5  ;;  %v455_v9 = vld [vmem:[%s5479_s1 + $0x100] sm:$0xff]  ;;  %v456_v10 = vld [vmem:[%s5479_s1 + $0x108] sm:$0xff]  ;;  %3644 = vmatprep.subr.bf16.mxu0 %v3643_v3  ;;  %v473_v14 = vld [vmem:[%s5479_s1 + $0x190] sm:$0xff]  ;;  %v3647_v16 = vpack.c.bf16 %v442_v13, %v441_v11  ;;  %s4098_s15 = smul.u32 80, %s5500_s20  ;;  %s412_s27 = scalar_lea.vmem %s5489_s11, %s5500_s20 }
  0x4a   : > { %v3677_v12 = vpack.c.bf16 %v456_v10, %v455_v9  ;;  %v474_v15 = vld [vmem:[%s5479_s1 + $0x198] sm:$0xff]  ;;  %3676 = vmatprep.subr.bf16.mxu1 %v3675_v7  ;;  %v425_v18 = vld [vmem:[%s5479_s1 + $0x10] sm:$0xff]  ;;  %v443_v23 = vld [vmem:[%s5479_s1 + $0xa0] sm:$0xff] }
  0x4b   : > { %3646 = vmatpush3.bf16.msra.mxu0 %v3645_v8  ;;  %v3679_v17 = vpack.c.bf16 %v474_v15, %v473_v14  ;;  %v426_v19 = vld [vmem:[%s5479_s1 + $0x18] sm:$0xff]  ;;  %v457_v20 = vld [vmem:[%s5479_s1 + $0x110] sm:$0xff]  ;;  %v444_v24 = vld [vmem:[%s5479_s1 + $0xa8] sm:$0xff]  ;;  %s4526_s23 = scalar_lea.vmem %s5478_s0, %s4098_s15 }
  0x4c   : > { %3678 = vmatpush3.bf16.msra.mxu1 %v3677_v12  ;;  %v3649_v21 = vpack.c.bf16 %v426_v19, %v425_v18  ;;  %v458_v22 = vld [vmem:[%s5479_s1 + $0x118] sm:$0xff]  ;;  %3648 = vmatprep.subr.bf16.mxu0 %v3647_v16  ;;  %v3651_v26 = vpack.c.bf16 %v444_v24, %v443_v23  ;;  %v475_v27 = vld [vmem:[%s5479_s1 + $0x1a0] sm:$0xff]  ;;  %v476_v28 = vld [vmem:[%s5479_s1 + $0x1a8] sm:$0xff] }
  0x4d   : > { %3680 = vmatprep.subr.bf16.mxu1 %v3679_v17  ;;  %v3681_v25 = vpack.c.bf16 %v458_v22, %v457_v20  ;;  %v427_v29 = vld [vmem:[%s5479_s1 + $0x20] sm:$0xff]  ;;  %v3683_v30 = vpack.c.bf16 %v476_v28, %v475_v27  ;;  %v428_v31 = vld [vmem:[%s5479_s1 + $0x28] sm:$0xff]  ;;  %v445_v35 = vld [vmem:[%s5479_s1 + $0xb0] sm:$0xff] }
  0x4e   : > { %v459_v32 = vld [vmem:[%s5479_s1 + $0x120] sm:$0xff]  ;;  %v460_v33 = vld [vmem:[%s5479_s1 + $0x128] sm:$0xff]  ;;  %v3653_v34 = vpack.c.bf16 %v428_v31, %v427_v29  ;;  %v446_v36 = vld [vmem:[%s5479_s1 + $0xb8] sm:$0xff] }
  0x4f   : > { %3650 = vmatpush3.bf16.msra.mxu0 %v3649_v21  ;;  %v477_v37 = vld [vmem:[%s5479_s1 + $0x1b0] sm:$0xff]  ;;  %v3685_v38 = vpack.c.bf16 %v460_v33, %v459_v32  ;;  %v3655_v39 = vpack.c.bf16 %v446_v36, %v445_v35  ;;  %v478_v40 = vld [vmem:[%s5479_s1 + $0x1b8] sm:$0xff]  ;;  %v447_v46 = vld [vmem:[%s5479_s1 + $0xc0] sm:$0xff] }
  0x50   : > { %3682 = vmatpush3.bf16.msra.mxu1 %v3681_v25  ;;  %3652 = vmatprep.subr.bf16.mxu0 %v3651_v26  ;;  %v429_v41 = vld [vmem:[%s5479_s1 + $0x30] sm:$0xff]  ;;  %v430_v42 = vld [vmem:[%s5479_s1 + $0x38] sm:$0xff]  ;;  %v3687_v43 = vpack.c.bf16 %v478_v40, %v477_v37  ;;  %v448_v47 = vld [vmem:[%s5479_s1 + $0xc8] sm:$0xff] }
  0x51   : > { %3684 = vmatprep.subr.bf16.mxu1 %v3683_v30  ;;  %v461_v44 = vld [vmem:[%s5479_s1 + $0x130] sm:$0xff]  ;;  %v462_v45 = vld [vmem:[%s5479_s1 + $0x138] sm:$0xff]  ;;  %v479_v48 = vld [vmem:[%s5479_s1 + $0x1c0] sm:$0xff]  ;;  %v3657_v50 = vpack.c.bf16 %v430_v42, %v429_v41  ;;  %v3659_v52 = vpack.c.bf16 %v448_v47, %v447_v46 }
  0x52   : > { %v480_v49 = vld [vmem:[%s5479_s1 + $0x1c8] sm:$0xff]  ;;  %v3689_v51 = vpack.c.bf16 %v462_v45, %v461_v44  ;;  %v431_v53 = vld [vmem:[%s5479_s1 + $0x40] sm:$0xff]  ;;  %v449_v58 = vld [vmem:[%s5479_s1 + $0xd0] sm:$0xff] }
  0x53   : > { %3654 = vmatpush3.bf16.msra.mxu0 %v3653_v34  ;;  %v432_v54 = vld [vmem:[%s5479_s1 + $0x48] sm:$0xff]  ;;  %v463_v55 = vld [vmem:[%s5479_s1 + $0x140] sm:$0xff]  ;;  %v3691_v56 = vpack.c.bf16 %v480_v49, %v479_v48  ;;  %v450_v59 = vld [vmem:[%s5479_s1 + $0xd8] sm:$0xff] }
  0x54   : > { %3686 = vmatpush3.bf16.msra.mxu1 %v3685_v38  ;;  %3656 = vmatprep.subr.bf16.mxu0 %v3655_v39  ;;  %v464_v57 = vld [vmem:[%s5479_s1 + $0x148] sm:$0xff]  ;;  %v481_v60 = vld [vmem:[%s5479_s1 + $0x1d0] sm:$0xff]  ;;  %v482_v61 = vld [vmem:[%s5479_s1 + $0x1d8] sm:$0xff]  ;;  %v3661_v62 = vpack.c.bf16 %v432_v54, %v431_v53  ;;  %v3663_v0 = vpack.c.bf16 %v450_v59, %v449_v58 }
  0x55   : > { %3688 = vmatprep.subr.bf16.mxu1 %v3687_v43  ;;  %v3693_v63 = vpack.c.bf16 %v464_v57, %v463_v55  ;;  %v433_v1 = vld [vmem:[%s5479_s1 + $0x50] sm:$0xff]  ;;  %v434_v2 = vld [vmem:[%s5479_s1 + $0x58] sm:$0xff]  ;;  %v3695_v4 = vpack.c.bf16 %v482_v61, %v481_v60  ;;  %v451_v6 = vld [vmem:[%s5479_s1 + $0xe0] sm:$0xff] }
  0x56   : > { %v465_v3 = vld [vmem:[%s5479_s1 + $0x150] sm:$0xff]  ;;  %v466_v5 = vld [vmem:[%s5479_s1 + $0x158] sm:$0xff]  ;;  %v452_v7 = vld [vmem:[%s5479_s1 + $0xe8] sm:$0xff]  ;;  %v3665_v10 = vpack.c.bf16 %v434_v2, %v433_v1 }
  0x57   : > { %3658 = vmatpush3.bf16.msra.mxu0 %v3657_v50  ;;  %v483_v8 = vld [vmem:[%s5479_s1 + $0x1e0] sm:$0xff]  ;;  %v484_v9 = vld [vmem:[%s5479_s1 + $0x1e8] sm:$0xff]  ;;  %v3697_v13 = vpack.c.bf16 %v466_v5, %v465_v3  ;;  %v3667_v14 = vpack.c.bf16 %v452_v7, %v451_v6  ;;  %v416_v17 = vld [vmem:[%s4526_s23 + $0x18] sm:$0xff]  ;;  %v4221_v5 = vmov 0.0|0.0  }
  0x58   : > { %3690 = vmatpush3.bf16.msra.mxu1 %v3689_v51  ;;  %3660 = vmatprep.subr.bf16.mxu0 %v3659_v52  ;;  %v435_v11 = vld [vmem:[%s5479_s1 + $0x60] sm:$0xff]  ;;  %v436_v12 = vld [vmem:[%s5479_s1 + $0x68] sm:$0xff]  ;;  %v3699_v18 = vpack.c.bf16 %v484_v9, %v483_v8  ;;  %v453_v20 = vld [vmem:[%s5479_s1 + $0xf0] sm:$0xff] }
  0x59   : > { %3692 = vmatprep.subr.bf16.mxu1 %v3691_v56  ;;  %v467_v15 = vld [vmem:[%s5479_s1 + $0x160] sm:$0xff]  ;;  %v414_v16 = vld [vmem:[%s4526_s23 + $0x8] sm:$0xff]  ;;  %v454_v21 = vld [vmem:[%s5479_s1 + $0xf8] sm:$0xff]  ;;  %642 = vmatprep.mubr.f32.mxu1 %v416_v17  ;;  %v3669_v24 = vpack.c.bf16 %v436_v12, %v435_v11 }
  0x5a   : > { %v468_v19 = vld [vmem:[%s5479_s1 + $0x168] sm:$0xff]  ;;  %567 = vmatprep.mubr.f32.mxu0 %v414_v16  ;;  %v485_v22 = vld [vmem:[%s5479_s1 + $0x1f0] sm:$0xff]  ;;  %v486_v23 = vld [vmem:[%s5479_s1 + $0x1f8] sm:$0xff]  ;;  %v3671_v26 = vpack.c.bf16 %v454_v21, %v453_v20 }
  0x5b   : > { %3662 = vmatpush3.bf16.msra.mxu0 %v3661_v62  ;;  %v3701_v25 = vpack.c.bf16 %v468_v19, %v467_v15  ;;  %v437_v27 = vld [vmem:[%s5479_s1 + $0x70] sm:$0xff]  ;;  %v438_v28 = vld [vmem:[%s5479_s1 + $0x78] sm:$0xff]  ;;  %v3703_v30 = vpack.c.bf16 %v486_v23, %v485_v22  ;;  %v487_v32 = vld [vmem:[%s5479_s1 + $0x200] sm:$0xff] }
  0x5c   : > { %3694 = vmatpush3.bf16.msra.mxu1 %v3693_v63  ;;  %3664 = vmatprep.subr.bf16.mxu0 %v3663_v0  ;;  %v469_v29 = vld [vmem:[%s5479_s1 + $0x170] sm:$0xff]  ;;  %v470_v31 = vld [vmem:[%s5479_s1 + $0x178] sm:$0xff]  ;;  %v488_v33 = vld [vmem:[%s5479_s1 + $0x208] sm:$0xff]  ;;  %v3673_v34 = vpack.c.bf16 %v438_v28, %v437_v27  ;;  %v4223_v27 = vmov 0.0  }
  0x5d   : > { %3696 = vmatprep.subr.bf16.mxu1 %v3695_v4  ;;  %v3705_v35 = vpack.c.bf16 %v470_v31, %v469_v29  ;;  %v3707_v36 = vpack.c.bf16 %v488_v33, %v487_v32  ;;  %v489_v37 = vld [vmem:[%s5479_s1 + $0x210] sm:$0xff]  ;;  %v490_v38 = vld [vmem:[%s5479_s1 + $0x218] sm:$0xff]  ;;  %v413_v39 = vld [vmem:[%s4526_s23] sm:$0xff] }
  0x5e   : > { %v415_v40 = vld [vmem:[%s4526_s23 + $0x10] sm:$0xff]  ;;  %v3711_v41 = vpack.c.bf16 %v490_v38, %v489_v37  ;;  %v491_v42 = vld [vmem:[%s5479_s1 + $0x220] sm:$0xff]  ;;  %v492_v43 = vld [vmem:[%s5479_s1 + $0x228] sm:$0xff] }
  0x5f   : > { %3666 = vmatpush3.bf16.msra.mxu0 %v3665_v10  ;;  %v419_v44 = vld [vmem:[%s4526_s23 + $0x30] sm:$0xff]  ;;  %v421_v45 = vld [vmem:[%s4526_s23 + $0x40] sm:$0xff]  ;;  %v418_v46 = vld [vmem:[%s4526_s23 + $0x28] sm:$0xff]  ;;  %v3715_v47 = vpack.c.bf16 %v492_v43, %v491_v42 }
  0x60   : > { %3698 = vmatpush3.bf16.msra.mxu1 %v3697_v13  ;;  %3668 = vmatprep.subr.bf16.mxu0 %v3667_v14  ;;  %v420_v48 = vld [vmem:[%s4526_s23 + $0x38] sm:$0xff]  ;;  %v493_v49 = vld [vmem:[%s5479_s1 + $0x230] sm:$0xff]  ;;  %v417_v51 = vld [vmem:[%s4526_s23 + $0x20] sm:$0xff] }
  0x61   : > { %3700 = vmatprep.subr.bf16.mxu1 %v3699_v18  ;;  %v494_v50 = vld [vmem:[%s5479_s1 + $0x238] sm:$0xff]  ;;  %v495_v53 = vld [vmem:[%s5479_s1 + $0x240] sm:$0xff]  ;;  %v496_v54 = vld [vmem:[%s5479_s1 + $0x248] sm:$0xff] }
  0x62   : > { %v3719_v52 = vpack.c.bf16 %v494_v50, %v493_v49  ;;  %v3723_v55 = vpack.c.bf16 %v496_v54, %v495_v53  ;;  %v497_v56 = vld [vmem:[%s5479_s1 + $0x250] sm:$0xff]  ;;  %v498_v57 = vld [vmem:[%s5479_s1 + $0x258] sm:$0xff]  ;;  %v499_v59 = vld [vmem:[%s5479_s1 + $0x260] sm:$0xff] }
  0x63   : > { %3670 = vmatpush3.bf16.msra.mxu0 %v3669_v24  ;;  %v3727_v58 = vpack.c.bf16 %v498_v57, %v497_v56  ;;  %v500_v60 = vld [vmem:[%s5479_s1 + $0x268] sm:$0xff]  ;;  %v501_v62 = vld [vmem:[%s5479_s1 + $0x270] sm:$0xff]  ;;  %v502_v63 = vld [vmem:[%s5479_s1 + $0x278] sm:$0xff] }
  0x64   : > { %3702 = vmatpush3.bf16.msra.mxu1 %v3701_v25  ;;  %3672 = vmatprep.subr.bf16.mxu0 %v3671_v26  ;;  %v3731_v61 = vpack.c.bf16 %v500_v60, %v499_v59  ;;  %v3735_v0 = vpack.c.bf16 %v502_v63, %v501_v62  ;;  %v422_v1 = vld [vmem:[%s4526_s23 + $0x48] sm:$0xff]  ;;  %v728_v2 = vld [vmem:[%s5484_s6] sm:$0xff]  ;;  %v730_v4 = vld [vmem:[%s5484_s6 + $0x10] sm:$0xff] }
  0x65   : > { %3704 = vmatprep.subr.bf16.mxu1 %v3703_v30  ;;  %v729_v3 = vld [vmem:[%s5484_s6 + $0x8] sm:$0xff]  ;;  %v731_v7 = vld [vmem:[%s5484_s6 + $0x18] sm:$0xff]  ;;  %v732_v9 = vld [vmem:[%s5484_s6 + $0x20] sm:$0xff] }
  0x66   : > { %v3740_v6 = vpack.c.bf16 %v729_v3, %v728_v2  ;;  %v3743_v8 = vpack.c.bf16 %v731_v7, %v730_v4  ;;  %v733_v10 = vld [vmem:[%s5484_s6 + $0x28] sm:$0xff]  ;;  %v734_v12 = vld [vmem:[%s5484_s6 + $0x30] sm:$0xff]  ;;  %v735_v13 = vld [vmem:[%s5484_s6 + $0x38] sm:$0xff] }
  0x67   : > { %3674 = vmatpush3.bf16.msra.mxu0 %v3673_v34  ;;  %v3746_v11 = vpack.c.bf16 %v733_v10, %v732_v9  ;;  %v3749_v14 = vpack.c.bf16 %v735_v13, %v734_v12  ;;  %v736_v15 = vld [vmem:[%s5484_s6 + $0x40] sm:$0xff]  ;;  %v737_v16 = vld [vmem:[%s5484_s6 + $0x48] sm:$0xff]  ;;  %v738_v18 = vld [vmem:[%s5484_s6 + $0x50] sm:$0xff] }
  0x68   : > { %3706 = vmatpush3.bf16.msra.mxu1 %v3705_v35  ;;  %3708 = vmatprep.subr.bf16.mxu0 %v3707_v36  ;;  %v3752_v17 = vpack.c.bf16 %v737_v16, %v736_v15  ;;  %v739_v19 = vld [vmem:[%s5484_s6 + $0x58] sm:$0xff]  ;;  %v740_v21 = vld [vmem:[%s5484_s6 + $0x60] sm:$0xff]  ;;  %v741_v22 = vld [vmem:[%s5484_s6 + $0x68] sm:$0xff] }
  0x69   : > { %3739 = vmatprep.subr.bf16.mxu1 %v4221_v5  ;;  %v3755_v20 = vpack.c.bf16 %v739_v19, %v738_v18  ;;  %v3758_v23 = vpack.c.bf16 %v741_v22, %v740_v21  ;;  %v742_v24 = vld [vmem:[%s5484_s6 + $0x70] sm:$0xff]  ;;  %v743_v25 = vld [vmem:[%s5484_s6 + $0x78] sm:$0xff]  ;;  %v1328_v2 = vld [vmem:[%s5481_s3 + $0x100] sm:$0xff] }
  0x6a   : > { %568 = vmatmul.mubr.f32.vlgmr.msra.gmra.mrb[0].mxu0 %v413_v39  ;;  %v3761_v26 = vpack.c.bf16 %v743_v25, %v742_v24  ;;  %v1329_v4 = vld [vmem:[%s5481_s3 + $0x108] sm:$0xff]  ;;  %v1346_v7 = vld [vmem:[%s5481_s3 + $0x190] sm:$0xff]  ;;  %v1348_v13 = vld [vmem:[%s5481_s3 + $0x1a0] sm:$0xff] }
  0x6b   : > { %643 = vmatmul.mubr.f32.vlgmr.msra.gmra.mrb[0].mxu1 %v415_v40  ;;  %3710 = vmatpush3.bf16.msra.mxu0 %v3707_v36  ;;  %v1330_v9 = vld [vmem:[%s5481_s3 + $0x110] sm:$0xff]  ;;  %v1332_v15 = vld [vmem:[%s5481_s3 + $0x120] sm:$0xff] }
  0x6c   : > { %3712 = vmatprep.subr.bf16.mxu0 %v3711_v41  ;;  %572 = vmatprep.mubr.f32.mxu0 %v419_v44  ;;  %v1350_v19 = vld [vmem:[%s5481_s3 + $0x1b0] sm:$0xff]  ;;  %v1352_v25 = vld [vmem:[%s5481_s3 + $0x1c0] sm:$0xff] }
  0x6d   : > { %647 = vmatprep.mubr.f32.mxu1 %v421_v45  ;;  %3741 = vmatpush3.bf16.msra.mxu1 %v3740_v6  ;;  %v1334_v21 = vld [vmem:[%s5481_s3 + $0x130] sm:$0xff] }
  0x6e   : > { %573 = vmatmul.mubr.f32.gmra.mrb[2].mxu0 %v418_v46  ;;  %3742 = vmatprep.subr.bf16.mxu1 %v4221_v5 }
  0x6f   : > { %3714 = vmatpush3.bf16.msra.mxu0 %v3711_v41  ;;  %648 = vmatmul.mubr.f32.gmra.mrb[2].mxu1 %v420_v48 }
  0x70   : > { %3716 = vmatprep.subr.bf16.mxu0 %v3715_v47  ;;  %3265 = vmatprep.mubr.f32.mxu0 %v417_v51 }
  0x71   : > { %3744 = vmatpush3.bf16.msra.mxu1 %v3743_v8  ;;  %3300 = vmatprep.mubr.msk.f32.mxu1 %vm4222_vm0, %v4223_v27 }
  0x72   : > { %3745 = vmatprep.subr.bf16.mxu1 %v4221_v5 }
  0x73   : > { %3718 = vmatpush3.bf16.msra.mxu0 %v3715_v47 }
  0x74   : > { %3720 = vmatprep.subr.bf16.mxu0 %v3719_v52 }
  0x75   : > { %3747 = vmatpush3.bf16.msra.mxu1 %v3746_v11 }
  0x76   : > { %3748 = vmatprep.subr.bf16.mxu1 %v4221_v5 }
  0x77   : > { %3722 = vmatpush3.bf16.msra.mxu0 %v3719_v52 }
  0x78   : > { %3724 = vmatprep.subr.bf16.mxu0 %v3723_v55 }
  0x79   : > { %3750 = vmatpush3.bf16.msra.mxu1 %v3749_v14 }
  0x7a   : > { %3751 = vmatprep.subr.bf16.mxu1 %v4221_v5 }
  0x7b   : > { %3726 = vmatpush3.bf16.msra.mxu0 %v3723_v55 }
  0x7c   : > { %3728 = vmatprep.subr.bf16.mxu0 %v3727_v58 }
  0x7d   : > { %3753 = vmatpush3.bf16.msra.mxu1 %v3752_v17 }
  0x7e   : > { %3754 = vmatprep.subr.bf16.mxu1 %v4221_v5 }
  0x7f   : > { %3730 = vmatpush3.bf16.msra.mxu0 %v3727_v58 }
  0x80   : > { %3732 = vmatprep.subr.bf16.mxu0 %v3731_v61 }
  0x81   : > { %3756 = vmatpush3.bf16.msra.mxu1 %v3755_v20 }
  0x82   : > { %3757 = vmatprep.subr.bf16.mxu1 %v4221_v5 }
  0x83   : > { %3734 = vmatpush3.bf16.msra.mxu0 %v3731_v61 }
  0x84   : > { %3736 = vmatprep.subr.bf16.mxu0 %v3735_v0 }
  0x85   : > { %3759 = vmatpush3.bf16.msra.mxu1 %v3758_v23 }
  0x86   : > { %3760 = vmatprep.subr.bf16.mxu1 %v4221_v5 }
  0x87   : > { %3738 = vmatpush3.bf16.msra.mxu0 %v3735_v0  ;;  %v1344_v0 = vld [vmem:[%s5481_s3 + $0x180] sm:$0xff] }
  0x88   : > { %3763 = vmatprep.subr.bf16.mxu0 %v4221_v5 }
  0x89   : > { %3762 = vmatpush3.bf16.msra.mxu1 %v3761_v26 }
  0x8a   : > { %3266 = vmatmul.mubr.f32.vlgmr.msra.gmra.mrb[4].mxu0 %v422_v1  ;;  %3787 = vmatprep.subr.bf16.mxu1 %v4221_v5  ;;  %v1345_v1 = vld [vmem:[%s5481_s3 + $0x188] sm:$0xff] }
  0x8b   : > { %3765 = vmatpush3.bf16.msra.mxu0 %v3740_v6  ;;  %3335 = vmatprep.mubr.msk.f32.mxu0 %vm4222_vm0, %v4223_v27  ;;  %v3834_v3 = vpack.c.bf16 %v1345_v1, %v1344_v0  ;;  %v3836_v6 = vpack.c.bf16 %v1329_v4, %v1328_v2  ;;  %v1298_v2 = vld [vmem:[%s5481_s3 + $0x10] sm:$0xff]  ;;  %v1316_v4 = vld [vmem:[%s5481_s3 + $0xa0] sm:$0xff] }
  0x8c   : > { %3766 = vmatprep.subr.bf16.mxu0 %v4221_v5 }
  0x8f   : > { %3768 = vmatpush3.bf16.msra.mxu0 %v3743_v8  ;;  %v1347_v8 = vld [vmem:[%s5481_s3 + $0x198] sm:$0xff] }
  0x90   : > { %3769 = vmatprep.subr.bf16.mxu0 %v4221_v5  ;;  %v3838_v10 = vpack.c.bf16 %v1347_v8, %v1346_v7 }
  0x93   : > { %3771 = vmatpush3.bf16.msra.mxu0 %v3746_v11  ;;  %v1331_v11 = vld [vmem:[%s5481_s3 + $0x118] sm:$0xff] }
  0x94   : > { %3772 = vmatprep.subr.bf16.mxu0 %v4221_v5  ;;  %v3840_v12 = vpack.c.bf16 %v1331_v11, %v1330_v9  ;;  %v1300_v9 = vld [vmem:[%s5481_s3 + $0x20] sm:$0xff]  ;;  %v1318_v11 = vld [vmem:[%s5481_s3 + $0xb0] sm:$0xff] }
  0x97   : > { %3774 = vmatpush3.bf16.msra.mxu0 %v3749_v14  ;;  %v1349_v14 = vld [vmem:[%s5481_s3 + $0x1a8] sm:$0xff] }
  0x98   : > { %3775 = vmatprep.subr.bf16.mxu0 %v4221_v5  ;;  %v3842_v16 = vpack.c.bf16 %v1349_v14, %v1348_v13 }
  0x9b   : > { %3777 = vmatpush3.bf16.msra.mxu0 %v3752_v17  ;;  %v1333_v17 = vld [vmem:[%s5481_s3 + $0x128] sm:$0xff] }
  0x9c   : > { %3778 = vmatprep.subr.bf16.mxu0 %v4221_v5  ;;  %v3844_v18 = vpack.c.bf16 %v1333_v17, %v1332_v15  ;;  %v1302_v15 = vld [vmem:[%s5481_s3 + $0x30] sm:$0xff]  ;;  %v1320_v17 = vld [vmem:[%s5481_s3 + $0xc0] sm:$0xff] }
  0x9f   : > { %3780 = vmatpush3.bf16.msra.mxu0 %v3755_v20  ;;  %v1351_v20 = vld [vmem:[%s5481_s3 + $0x1b8] sm:$0xff] }
  0xa0   : > { %3781 = vmatprep.subr.bf16.mxu0 %v4221_v5  ;;  %v3846_v22 = vpack.c.bf16 %v1351_v20, %v1350_v19 }
  0xa3   : > { %3783 = vmatpush3.bf16.msra.mxu0 %v3758_v23  ;;  %v1335_v23 = vld [vmem:[%s5481_s3 + $0x138] sm:$0xff] }
  0xa4   : > { %3784 = vmatprep.subr.bf16.mxu0 %v4221_v5  ;;  %v3848_v24 = vpack.c.bf16 %v1335_v23, %v1334_v21  ;;  %v1304_v21 = vld [vmem:[%s5481_s3 + $0x40] sm:$0xff]  ;;  %v1322_v23 = vld [vmem:[%s5481_s3 + $0xd0] sm:$0xff] }
  0xa7   : > { %3786 = vmatpush3.bf16.msra.mxu0 %v3761_v26  ;;  %v1353_v26 = vld [vmem:[%s5481_s3 + $0x1c8] sm:$0xff] }
  0xa8   : > { %3835 = vmatprep.subr.bf16.mxu0 %v3834_v3  ;;  %v1299_v3 = vld [vmem:[%s5481_s3 + $0x18] sm:$0xff] }
  0xa9   : > { %v3808_v7 = vpack.c.bf16 %v1299_v3, %v1298_v2 }
 0x13d   : > { %v2853_v28 = vpop.f32.mrb[0].mxu0 }
 0x13e   : > { %v2891_v29 = vpop.f32.mrb[0].mxu1  ;;  %v2854_v30 = vpop.f32.mrb[1].mxu0 }
 0x13f   : > { %v2855_v31 = vadd.f32 %v2854_v30, %v2853_v28  ;;  %v2892_v32 = vpop.f32.mrb[1].mxu1  ;;  %v1336_v28 = vld [vmem:[%s5481_s3 + $0x140] sm:$0xff]  ;;  %v1337_v30 = vld [vmem:[%s5481_s3 + $0x148] sm:$0xff] }
 0x140   : > { %v2893_v33 = vadd.f32 %v2892_v32, %v2891_v29  ;;  %v3850_v29 = vpack.c.bf16 %v1353_v26, %v1352_v25 }
 0x141   : > { %v2856_v34 = vpop.f32.mrb[2].mxu0 }
 0x142   : > { %v2894_v35 = vpop.f32.mrb[2].mxu1  ;;  %v2857_v36 = vpop.f32.mrb[3].mxu0  ;;  %v645_v37 = vadd.f32 %v2893_v33, %v2855_v31  ;;  %v3852_v31 = vpack.c.bf16 %v1337_v30, %v1336_v28  ;;  %v1306_v28 = vld [vmem:[%s5481_s3 + $0x50] sm:$0xff]  ;;  %v1324_v30 = vld [vmem:[%s5481_s3 + $0xe0] sm:$0xff] }
 0x143   : > { %v2858_v38 = vadd.f32 %v2857_v36, %v2856_v34  ;;  %v2895_v39 = vpop.f32.mrb[3].mxu1 }
 0x144   : > { %v2896_v40 = vadd.f32 %v2895_v39, %v2894_v35  ;;  %v905_v35 = vlaneseq }
 0x146   : > { %v650_v41 = vadd.f32 %v2896_v40, %v2858_v38  ;;  %v906_v40 = vshrl.u32 %v905_v35, 7 }
 0x15d   : > { %v3267_v42 = vpop.f32.mrb[4].mxu0 }
 0x15e   : > { %v4697_v43 = vadd.f32 %v3267_v42, %v650_v41  ;;  %v719_v44 = vpop.f32.mrb[5].mxu0  ;;  %v4770_v41 = vsub.s32 0, %v906_v40 }
 0x15f   : > { %v4699_v45 = vadd.f32 %v719_v44, %v645_v37 }
 0x160   : > { %v824_v46 = vmul.f32 %v4697_v43, %v4697_v43 }
 0x161   : > { %v744_v47 = vadd.f32 %v4697_v43, %v4699_v45  ;;  %v823_v48 = vmul.f32 %v4699_v45, %v4699_v45 }
 0x163   : > { %v745_v49 = vrot.slane %v744_v47, 4  ;;  %v825_v50 = vadd.f32 %v824_v46, %v823_v48 }
 0x165   : > { %v746_v51 = vadd.f32 %v745_v49, %v744_v47  ;;  %v826_v52 = vrot.slane %v825_v50, 4 }
 0x167   : > { %v747_v53 = vrot.slane %v746_v51, 2  ;;  %v827_v54 = vadd.f32 %v826_v52, %v825_v50 }
 0x169   : > { %v748_v55 = vadd.f32 %v747_v53, %v746_v51  ;;  %v828_v56 = vrot.slane %v827_v54, 2 }
 0x16b   : > { %v749_v57 = vrot.slane %v748_v55, 1  ;;  %v829_v58 = vadd.f32 %v828_v56, %v827_v54  ;;  %v921_v54 = vld [vmem:[#allocation2] sm:$0xff]  ;;  %v1313_v56 = vld [vmem:[%s5481_s3 + $0x88] sm:$0xff] }
 0x16d   : > { %v750_v59 = vadd.f32 %v749_v57, %v748_v55  ;;  %v830_v60 = vrot.slane %v829_v58, 1  ;;  %v1312_v55 = vld [vmem:[%s5481_s3 + $0x80] sm:$0xff]  ;;  %v1147_v57 = vld [vmem:[#allocation2 + $0x18] sm:$0xff] }
 0x16f   : > { %v752_v61 = vmul.f32 0.0625, %v750_v59  ;;  %v831_v62 = vadd.f32 %v830_v60, %v829_v58  ;;  %v3802_v58 = vpack.c.bf16 %v1313_v56, %v1312_v55  ;;  %v1296_v59 = vld [vmem:[%s5481_s3] sm:$0xff]  ;;  %v1297_v60 = vld [vmem:[%s5481_s3 + $0x8] sm:$0xff] }
 0x170   : > { %v3804_v0 = vpack.c.bf16 %v1297_v60, %v1296_v59  ;;  %v1341_v55 = vld [vmem:[%s5481_s3 + $0x168] sm:$0xff]  ;;  %v1342_v60 = vld [vmem:[%s5481_s3 + $0x170] sm:$0xff] }
 0x171   : > { %3301 = vmatmul.mubr.f32.vlgmr.msra.gmra.mrb[4].mxu1 %v752_v61  ;;  %v832_v63 = vmul.f32 0.0625, %v831_v62  ;;  %v1314_v61 = vld [vmem:[%s5481_s3 + $0x90] sm:$0xff]  ;;  %v1315_v62 = vld [vmem:[%s5481_s3 + $0x98] sm:$0xff] }
 0x172   : > { %3342 = vmatprep.mubr.msk.f32.mxu1 %vm4222_vm0, %v4223_v27  ;;  %v3806_v1 = vpack.c.bf16 %v1315_v62, %v1314_v61  ;;  %v1343_v61 = vld [vmem:[%s5481_s3 + $0x178] sm:$0xff] }
 0x173   : > { %3336 = vmatmul.mubr.f32.vlgmr.msra.gmra.mrb[6].mxu0 %v832_v63  ;;  %v1222_v63 = vld [vmem:[#allocation2 + $0x20] sm:$0xff]  ;;  %v3864_v62 = vpack.c.bf16 %v1343_v61, %v1342_v60 }
 0x174   : > { %3837 = vmatpush3.bf16.msra.mxu0 %v3836_v6  ;;  %v1317_v6 = vld [vmem:[%s5481_s3 + $0xa8] sm:$0xff] }
 0x175   : > { %3839 = vmatprep.subr.bf16.mxu0 %v3838_v10  ;;  %v3810_v8 = vpack.c.bf16 %v1317_v6, %v1316_v4  ;;  %v1301_v10 = vld [vmem:[%s5481_s3 + $0x28] sm:$0xff]  ;;  %v1362_v6 = vld [vmem:[%s5481_s3 + $0x210] sm:$0xff] }
 0x176   : > { %v3812_v13 = vpack.c.bf16 %v1301_v10, %v1300_v9 }
 0x178   : > { %3841 = vmatpush3.bf16.msra.mxu0 %v3840_v12  ;;  %v1319_v12 = vld [vmem:[%s5481_s3 + $0xb8] sm:$0xff] }
 0x179   : > { %3843 = vmatprep.subr.bf16.mxu0 %v3842_v16  ;;  %v3814_v14 = vpack.c.bf16 %v1319_v12, %v1318_v11  ;;  %v1303_v16 = vld [vmem:[%s5481_s3 + $0x38] sm:$0xff]  ;;  %v1364_v11 = vld [vmem:[%s5481_s3 + $0x220] sm:$0xff]  ;;  %v1365_v12 = vld [vmem:[%s5481_s3 + $0x228] sm:$0xff] }
 0x17a   : > { %v3816_v19 = vpack.c.bf16 %v1303_v16, %v1302_v15  ;;  %v1366_v16 = vld [vmem:[%s5481_s3 + $0x230] sm:$0xff] }
 0x17c   : > { %3845 = vmatpush3.bf16.msra.mxu0 %v3844_v18  ;;  %v1321_v18 = vld [vmem:[%s5481_s3 + $0xc8] sm:$0xff] }
 0x17d   : > { %3847 = vmatprep.subr.bf16.mxu0 %v3846_v22  ;;  %v3818_v20 = vpack.c.bf16 %v1321_v18, %v1320_v17  ;;  %v1305_v22 = vld [vmem:[%s5481_s3 + $0x48] sm:$0xff]  ;;  %v1367_v17 = vld [vmem:[%s5481_s3 + $0x238] sm:$0xff] }
 0x17e   : > { %v3820_v25 = vpack.c.bf16 %v1305_v22, %v1304_v21  ;;  %v1369_v21 = vld [vmem:[%s5481_s3 + $0x248] sm:$0xff] }
 0x180   : > { %3849 = vmatpush3.bf16.msra.mxu0 %v3848_v24  ;;  %v1323_v24 = vld [vmem:[%s5481_s3 + $0xd8] sm:$0xff] }
 0x181   : > { %3851 = vmatprep.subr.bf16.mxu0 %v3850_v29  ;;  %v3822_v26 = vpack.c.bf16 %v1323_v24, %v1322_v23  ;;  %v1307_v29 = vld [vmem:[%s5481_s3 + $0x58] sm:$0xff] }
 0x184   : > { %3853 = vmatpush3.bf16.msra.mxu0 %v3852_v31  ;;  %v1325_v31 = vld [vmem:[%s5481_s3 + $0xe8] sm:$0xff] }
 0x244   : > { %v819_v32 = vpop.f32.mrb[4].mxu1 }
 0x245   : > { %v903_v33 = vmul.f32 %v819_v32, %v819_v32  ;;  %v3302_v34 = vpop.f32.mrb[5].mxu1  ;;  %v908_v42 = vrot.slane %v819_v32, %v4770_v41  ;;  %v3824_v32 = vpack.c.bf16 %v1307_v29, %v1306_v28  ;;  %v1372_v29 = vld [vmem:[%s5481_s3 + $0x260] sm:$0xff] }
 0x246   : > { %v899_v36 = vpop.f32.mrb[6].mxu0  ;;  %v1308_v34 = vld [vmem:[%s5481_s3 + $0x60] sm:$0xff] }
 0x247   : > { %v904_v37 = vsub.f32 %v899_v36, %v903_v33  ;;  %v3337_v38 = vpop.f32.mrb[7].mxu0  ;;  %v909_v46 = vsub.f32 %v4699_v45, %v908_v42  ;;  %v910_v47 = vsub.f32 %v4697_v43, %v908_v42  ;;  %v997_v45 = vld [vmem:[#allocation2 + $0x8] sm:$0xff]  ;;  %v1072_v43 = vld [vmem:[#allocation2 + $0x10] sm:$0xff]  ;;  %v3826_v33 = vpack.c.bf16 %v1325_v31, %v1324_v30 }
 0x248   : > { %v1309_v36 = vld [vmem:[%s5481_s3 + $0x68] sm:$0xff]  ;;  %v1326_v38 = vld [vmem:[%s5481_s3 + $0xf0] sm:$0xff] }
 0x249   : > { %v911_v39 = vadd.f32 1e-05, %v904_v37  ;;  %v3828_v37 = vpack.c.bf16 %v1309_v36, %v1308_v34  ;;  %v1310_v42 = vld [vmem:[%s5481_s3 + $0x70] sm:$0xff]  ;;  %v1373_v30 = vld [vmem:[%s5481_s3 + $0x268] sm:$0xff]  ;;  %v1586_v36 = vld [vmem:[%s5485_s7] sm:$0xff] }
 0x24a   : > { %v3885_v31 = vpack.c.bf16 %v1373_v30, %v1372_v29  ;;  %v2198_v30 = vld [vmem:[%s5483_s5 + $0x190] sm:$0xff] }
 0x24b   : > { %4135 = vrsqrt.f32 %v911_v39  ;;  %v1327_v39 = vld [vmem:[%s5481_s3 + $0xf8] sm:$0xff] }
 0x24c   : > { %v3830_v40 = vpack.c.bf16 %v1327_v39, %v1326_v38  ;;  %v1588_v38 = vld [vmem:[%s5485_s7 + $0x10] sm:$0xff] }
 0x255   : > { %v4136_v44 = vpop.eup %4135 }
 0x256   : > { %v916_v48 = vrot.slane %v4136_v44, %v4770_v41  ;;  %v1311_v44 = vld [vmem:[%s5481_s3 + $0x78] sm:$0xff] }
 0x258   : > { %v917_v49 = vmul.f32 %v916_v48, %v909_v46  ;;  %v918_v50 = vmul.f32 %v916_v48, %v910_v47  ;;  %v1354_v46 = vld [vmem:[%s5481_s3 + $0x1d0] sm:$0xff]  ;;  %v3832_v47 = vpack.c.bf16 %v1311_v44, %v1310_v42  ;;  %v1355_v48 = vld [vmem:[%s5481_s3 + $0x1d8] sm:$0xff]  ;;  %v1590_v44 = vld [vmem:[%s5485_s7 + $0x20] sm:$0xff] }
 0x25a   : > { %v919_v51 = vmax.f32 %v917_v49, 0.0  ;;  %v920_v52 = vmax.f32 %v918_v50, 0.0  ;;  %v1338_v49 = vld [vmem:[%s5481_s3 + $0x150] sm:$0xff]  ;;  %v1339_v50 = vld [vmem:[%s5481_s3 + $0x158] sm:$0xff] }
 0x25c   : > { %v3788_v53 = vpack.c.bf16 %v920_v52, %v919_v51  ;;  %v3854_v51 = vpack.c.bf16 %v1355_v48, %v1354_v46  ;;  %v3856_v52 = vpack.c.bf16 %v1339_v50, %v1338_v49  ;;  %v1591_v46 = vld [vmem:[%s5485_s7 + $0x28] sm:$0xff]  ;;  %v1592_v48 = vld [vmem:[%s5485_s7 + $0x30] sm:$0xff]  ;;  %v1593_v49 = vld [vmem:[%s5485_s7 + $0x38] sm:$0xff] }
 0x25d   : > { %v3900_v50 = vpack.c.bf16 %v1593_v49, %v1592_v48  ;;  %v2186_v48 = vld [vmem:[%s5483_s5 + $0x130] sm:$0xff] }
 0x25e   : > { %3789 = vmatpush3.bf16.msra.mxu1 %v3788_v53  ;;  %3855 = vmatprep.subr.bf16.mxu0 %v3854_v51  ;;  %v1594_v51 = vld [vmem:[%s5485_s7 + $0x40] sm:$0xff] }
 0x25f   : > { %3790 = vmatprep.subr.bf16.mxu1 %v4221_v5  ;;  %3857 = vmatpush3.bf16.msra.mxu0 %v3856_v52  ;;  %v1595_v52 = vld [vmem:[%s5485_s7 + $0x48] sm:$0xff] }
 0x261   : > { %3343 = vmatmul.mubr.msk.f32.vlgmr.msra.gmra.mrb[6].mxu1 %vm922_vm1, %v921_v54  ;;  %v1357_v54 = vld [vmem:[%s5481_s3 + $0x1e8] sm:$0xff] }
 0x262   : > { %3792 = vmatpush3.bf16.msra.mxu1 %v3788_v53  ;;  %3349 = vmatprep.mubr.msk.f32.mxu1 %vm4222_vm0, %v4223_v27 }
 0x263   : > { %3793 = vmatprep.subr.bf16.mxu1 %v4221_v5 }
 0x265   : > { %3350 = vmatmul.mubr.msk.f32.vlgmr.msra.gmra.mrb[8].mxu1 %vm922_vm1, %v997_v45 }
 0x266   : > { %3795 = vmatpush3.bf16.msra.mxu1 %v3788_v53  ;;  %3356 = vmatprep.mubr.msk.f32.mxu1 %vm4222_vm0, %v4223_v27 }
 0x267   : > { %3796 = vmatprep.subr.bf16.mxu1 %v4221_v5 }
 0x269   : > { %3357 = vmatmul.mubr.msk.f32.vlgmr.msra.gmra.mrb[10].mxu1 %vm922_vm1, %v1072_v43  ;;  %v1340_v43 = vld [vmem:[%s5481_s3 + $0x160] sm:$0xff] }
 0x26a   : > { %3798 = vmatpush3.bf16.msra.mxu1 %v3788_v53  ;;  %3363 = vmatprep.mubr.msk.f32.mxu1 %vm4222_vm0, %v4223_v27  ;;  %v3860_v56 = vpack.c.bf16 %v1341_v55, %v1340_v43  ;;  %v1598_v55 = vld [vmem:[%s5485_s7 + $0x60] sm:$0xff] }
 0x26b   : > { %3799 = vmatprep.subr.bf16.mxu1 %v4221_v5 }
 0x26d   : > { %3364 = vmatmul.mubr.msk.f32.vlgmr.msra.gmra.mrb[12].mxu1 %vm922_vm1, %v1147_v57  ;;  %v1358_v57 = vld [vmem:[%s5481_s3 + $0x1f0] sm:$0xff] }
 0x26e   : > { %3801 = vmatpush3.bf16.msra.mxu1 %v3788_v53  ;;  %3370 = vmatprep.mubr.msk.f32.mxu1 %vm4222_vm0, %v4223_v27  ;;  %v1356_v53 = vld [vmem:[%s5481_s3 + $0x1e0] sm:$0xff] }
 0x26f   : > { %3803 = vmatprep.subr.bf16.mxu1 %v3802_v58  ;;  %v3858_v45 = vpack.c.bf16 %v1357_v54, %v1356_v53  ;;  %v1359_v58 = vld [vmem:[%s5481_s3 + $0x1f8] sm:$0xff]  ;;  %v3903_v53 = vpack.c.bf16 %v1595_v52, %v1594_v51  ;;  %v1596_v54 = vld [vmem:[%s5485_s7 + $0x50] sm:$0xff]  ;;  %v2204_v52 = vld [vmem:[%s5483_s5 + $0x1c0] sm:$0xff] }
 0x270   : > { %v3862_v59 = vpack.c.bf16 %v1359_v58, %v1358_v57  ;;  %v1600_v57 = vld [vmem:[%s5485_s7 + $0x70] sm:$0xff] }
 0x271   : > { %3371 = vmatmul.mubr.msk.f32.vlgmr.msra.gmra.mrb[14].mxu1 %vm922_vm1, %v1222_v63  ;;  %3859 = vmatprep.subr.bf16.mxu0 %v3858_v45  ;;  %v1597_v45 = vld [vmem:[%s5485_s7 + $0x58] sm:$0xff] }
 0x272   : > { %3805 = vmatpush3.bf16.msra.mxu1 %v3804_v0  ;;  %3861 = vmatpush3.bf16.msra.mxu0 %v3860_v56  ;;  %v1360_v0 = vld [vmem:[%s5481_s3 + $0x200] sm:$0xff]  ;;  %v3906_v43 = vpack.c.bf16 %v1597_v45, %v1596_v54  ;;  %v1599_v56 = vld [vmem:[%s5485_s7 + $0x68] sm:$0xff] }
 0x273   : > { %3807 = vmatprep.subr.bf16.mxu1 %v3806_v1  ;;  %3863 = vmatprep.subr.bf16.mxu0 %v3862_v59  ;;  %v1361_v1 = vld [vmem:[%s5481_s3 + $0x208] sm:$0xff]  ;;  %v3909_v58 = vpack.c.bf16 %v1599_v56, %v1598_v55  ;;  %v1601_v59 = vld [vmem:[%s5485_s7 + $0x78] sm:$0xff]  ;;  %v2188_v54 = vld [vmem:[%s5483_s5 + $0x140] sm:$0xff] }
 0x274   : > { %v3867_v3 = vpack.c.bf16 %v1361_v1, %v1360_v0  ;;  %v3912_v60 = vpack.c.bf16 %v1601_v59, %v1600_v57 }
 0x276   : > { %3809 = vmatpush3.bf16.msra.mxu1 %v3808_v7  ;;  %3865 = vmatpush3.bf16.msra.mxu0 %v3864_v62  ;;  %v1363_v7 = vld [vmem:[%s5481_s3 + $0x218] sm:$0xff] }
 0x277   : > { %3811 = vmatprep.subr.bf16.mxu1 %v3810_v8  ;;  %3890 = vmatprep.subr.bf16.mxu0 %v4221_v5  ;;  %v3870_v9 = vpack.c.bf16 %v1363_v7, %v1362_v6 }
 0x27a   : > { %3813 = vmatpush3.bf16.msra.mxu1 %v3812_v13 }
 0x27b   : > { %3815 = vmatprep.subr.bf16.mxu1 %v3814_v14  ;;  %v3873_v14 = vpack.c.bf16 %v1365_v12, %v1364_v11 }
 0x27e   : > { %3817 = vmatpush3.bf16.msra.mxu1 %v3816_v19  ;;  %v3876_v19 = vpack.c.bf16 %v1367_v17, %v1366_v16 }
 0x27f   : > { %3819 = vmatprep.subr.bf16.mxu1 %v3818_v20  ;;  %v1368_v20 = vld [vmem:[%s5481_s3 + $0x240] sm:$0xff] }
 0x280   : > { %v3879_v24 = vpack.c.bf16 %v1369_v21, %v1368_v20 }
 0x282   : > { %3821 = vmatpush3.bf16.msra.mxu1 %v3820_v25  ;;  %v1370_v25 = vld [vmem:[%s5481_s3 + $0x250] sm:$0xff] }
 0x283   : > { %3823 = vmatprep.subr.bf16.mxu1 %v3822_v26  ;;  %v1371_v26 = vld [vmem:[%s5481_s3 + $0x258] sm:$0xff] }
 0x284   : > { %v3882_v28 = vpack.c.bf16 %v1371_v26, %v1370_v25  ;;  %v2180_v25 = vld [vmem:[%s5483_s5 + $0x100] sm:$0xff] }
 0x286   : > { %3825 = vmatpush3.bf16.msra.mxu1 %v3824_v32  ;;  %v1374_v32 = vld [vmem:[%s5481_s3 + $0x270] sm:$0xff] }
 0x287   : > { %3827 = vmatprep.subr.bf16.mxu1 %v3826_v33  ;;  %v1375_v33 = vld [vmem:[%s5481_s3 + $0x278] sm:$0xff] }
 0x288   : > { %v3888_v34 = vpack.c.bf16 %v1375_v33, %v1374_v32  ;;  %v2182_v32 = vld [vmem:[%s5483_s5 + $0x110] sm:$0xff] }
 0x28a   : > { %3829 = vmatpush3.bf16.msra.mxu1 %v3828_v37  ;;  %v1587_v37 = vld [vmem:[%s5485_s7 + $0x8] sm:$0xff] }
 0x28b   : > { %3831 = vmatprep.subr.bf16.mxu1 %v3830_v40  ;;  %v3891_v39 = vpack.c.bf16 %v1587_v37, %v1586_v36  ;;  %v1589_v40 = vld [vmem:[%s5485_s7 + $0x18] sm:$0xff]  ;;  %v2200_v37 = vld [vmem:[%s5483_s5 + $0x1a0] sm:$0xff] }
 0x28c   : > { %v3894_v42 = vpack.c.bf16 %v1589_v40, %v1588_v38  ;;  %v2201_v38 = vld [vmem:[%s5483_s5 + $0x1a8] sm:$0xff] }
 0x28d   : > { %v3978_v40 = vpack.c.bf16 %v2201_v38, %v2200_v37  ;;  %v2173_v37 = vld [vmem:[%s5483_s5 + $0xc8] sm:$0xff] }
 0x28e   : > { %3833 = vmatpush3.bf16.msra.mxu1 %v3832_v47  ;;  %v3897_v47 = vpack.c.bf16 %v1591_v46, %v1590_v44  ;;  %v2202_v46 = vld [vmem:[%s5483_s5 + $0x1b0] sm:$0xff] }
 0x28f   : > { %3866 = vmatprep.subr.bf16.mxu1 %v4221_v5 }
 0x334   : > { %v992_v63 = vpop.f32.mrb[6].mxu1 }
 0x335   : > { %v3344_v2 = vpop.f32.mrb[7].mxu1 }
 0x338   : > { %v1067_v4 = vpop.f32.mrb[8].mxu1 }
 0x339   : > { %v3351_v8 = vpop.f32.mrb[9].mxu1  ;;  %1440 = vmatprep.mubr.f32.mxu1 %v1067_v4 }
 0x33a   : > { %1441 = vmatmul.mubr.f32.vlgmr.msra.gmra.mrb[16].mxu1 %v992_v63 }
 0x33b   : > { %3868 = vmatpush3.bf16.msra.mxu1 %v3867_v3  ;;  %3405 = vmatprep.mubr.msk.f32.mxu1 %vm4222_vm0, %v4223_v27 }
 0x33c   : > { %3869 = vmatprep.subr.bf16.mxu1 %v4221_v5  ;;  %v1142_v10 = vpop.f32.mrb[10].mxu1 }
 0x33d   : > { %v3358_v13 = vpop.f32.mrb[11].mxu1 }
 0x33f   : > { %3871 = vmatpush3.bf16.msra.mxu1 %v3870_v9 }
 0x340   : > { %v1217_v15 = vpop.f32.mrb[12].mxu1  ;;  %3872 = vmatprep.subr.bf16.mxu1 %v4221_v5 }
 0x341   : > { %1510 = vmatprep.mubr.f32.mxu0 %v1217_v15  ;;  %v3365_v18 = vpop.f32.mrb[13].mxu1 }
 0x342   : > { %1511 = vmatmul.mubr.f32.vlgmr.msra.gmra.mrb[8].mxu0 %v1142_v10 }
 0x343   : > { %3874 = vmatpush3.bf16.msra.mxu1 %v3873_v14  ;;  %3440 = vmatprep.mubr.msk.f32.mxu0 %vm4222_vm0, %v4223_v27 }
 0x344   : > { %3875 = vmatprep.subr.bf16.mxu1 %v4221_v5  ;;  %v1292_v22 = vpop.f32.mrb[14].mxu1  ;;  %3892 = vmatpush3.bf16.msra.mxu0 %v3891_v39 }
 0x345   : > { %v3372_v23 = vpop.f32.mrb[15].mxu1  ;;  %3893 = vmatprep.subr.bf16.mxu0 %v4221_v5 }
 0x346   : > { %v2196_v23 = vld [vmem:[%s5483_s5 + $0x180] sm:$0xff] }
 0x347   : > { %3877 = vmatpush3.bf16.msra.mxu1 %v3876_v19 }
 0x348   : > { %3878 = vmatprep.subr.bf16.mxu1 %v4221_v5  ;;  %3895 = vmatpush3.bf16.msra.mxu0 %v3894_v42 }
 0x349   : > { %3896 = vmatprep.subr.bf16.mxu0 %v4221_v5 }
 0x34b   : > { %3880 = vmatpush3.bf16.msra.mxu1 %v3879_v24  ;;  %v2197_v24 = vld [vmem:[%s5483_s5 + $0x188] sm:$0xff] }
 0x34c   : > { %3881 = vmatprep.subr.bf16.mxu1 %v4221_v5  ;;  %3898 = vmatpush3.bf16.msra.mxu0 %v3897_v47  ;;  %v3970_v26 = vpack.c.bf16 %v2197_v24, %v2196_v23  ;;  %v2169_v23 = vld [vmem:[%s5483_s5 + $0xa8] sm:$0xff] }
 0x34d   : > { %3899 = vmatprep.subr.bf16.mxu0 %v4221_v5 }
 0x34f   : > { %3883 = vmatpush3.bf16.msra.mxu1 %v3882_v28  ;;  %v2181_v28 = vld [vmem:[%s5483_s5 + $0x108] sm:$0xff] }
 0x350   : > { %3884 = vmatprep.subr.bf16.mxu1 %v4221_v5  ;;  %3901 = vmatpush3.bf16.msra.mxu0 %v3900_v50  ;;  %v3972_v29 = vpack.c.bf16 %v2181_v28, %v2180_v25  ;;  %v2153_v28 = vld [vmem:[%s5483_s5 + $0x28] sm:$0xff] }
 0x351   : > { %3902 = vmatprep.subr.bf16.mxu0 %v4221_v5 }
 0x353   : > { %3886 = vmatpush3.bf16.msra.mxu1 %v3885_v31  ;;  %v2199_v31 = vld [vmem:[%s5483_s5 + $0x198] sm:$0xff] }
 0x354   : > { %3887 = vmatprep.subr.bf16.mxu1 %v4221_v5  ;;  %3904 = vmatpush3.bf16.msra.mxu0 %v3903_v53  ;;  %v3974_v33 = vpack.c.bf16 %v2199_v31, %v2198_v30  ;;  %v2171_v30 = vld [vmem:[%s5483_s5 + $0xb8] sm:$0xff] }
 0x355   : > { %3905 = vmatprep.subr.bf16.mxu0 %v4221_v5 }
 0x357   : > { %3889 = vmatpush3.bf16.msra.mxu1 %v3888_v34  ;;  %v2183_v34 = vld [vmem:[%s5483_s5 + $0x118] sm:$0xff] }
 0x358   : > { %3914 = vmatprep.subr.bf16.mxu1 %v4221_v5  ;;  %3907 = vmatpush3.bf16.msra.mxu0 %v3906_v43  ;;  %v3976_v36 = vpack.c.bf16 %v2183_v34, %v2182_v32  ;;  %v2155_v34 = vld [vmem:[%s5483_s5 + $0x38] sm:$0xff] }
 0x359   : > { %3908 = vmatprep.subr.bf16.mxu0 %v4221_v5 }
 0x35a   : > { %3406 = vmatmul.mubr.f32.vlgmr.msra.gmra.mrb[18].mxu1 %v1292_v22 }
 0x35b   : > { %3475 = vmatprep.mubr.msk.f32.mxu1 %vm4222_vm0, %v4223_v27  ;;  %3916 = vmatpush3.bf16.msra.mxu1 %v3891_v39  ;;  %v2184_v39 = vld [vmem:[%s5483_s5 + $0x120] sm:$0xff] }
 0x35c   : > { %3917 = vmatprep.subr.bf16.mxu1 %v4221_v5  ;;  %3910 = vmatpush3.bf16.msra.mxu0 %v3909_v58 }
 0x35d   : > { %3911 = vmatprep.subr.bf16.mxu0 %v4221_v5 }
 0x35f   : > { %3919 = vmatpush3.bf16.msra.mxu1 %v3894_v42  ;;  %v2185_v42 = vld [vmem:[%s5483_s5 + $0x128] sm:$0xff] }
 0x360   : > { %3920 = vmatprep.subr.bf16.mxu1 %v4221_v5  ;;  %3913 = vmatpush3.bf16.msra.mxu0 %v3912_v60  ;;  %v3980_v44 = vpack.c.bf16 %v2185_v42, %v2184_v39  ;;  %v2157_v42 = vld [vmem:[%s5483_s5 + $0x48] sm:$0xff] }
 0x361   : > { %3478 = vmatprep.subr.mxu0 %v4223_v27 }
 0x363   : > { %3922 = vmatpush3.bf16.msra.mxu1 %v3897_v47  ;;  %v2203_v47 = vld [vmem:[%s5483_s5 + $0x1b8] sm:$0xff] }
 0x364   : > { %3923 = vmatprep.subr.bf16.mxu1 %v4221_v5  ;;  %v3982_v49 = vpack.c.bf16 %v2203_v47, %v2202_v46  ;;  %v2175_v46 = vld [vmem:[%s5483_s5 + $0xd8] sm:$0xff] }
 0x367   : > { %3925 = vmatpush3.bf16.msra.mxu1 %v3900_v50  ;;  %v2187_v50 = vld [vmem:[%s5483_s5 + $0x138] sm:$0xff] }
 0x368   : > { %3926 = vmatprep.subr.bf16.mxu1 %v4221_v5  ;;  %v3984_v51 = vpack.c.bf16 %v2187_v50, %v2186_v48  ;;  %v2159_v50 = vld [vmem:[%s5483_s5 + $0x58] sm:$0xff] }
 0x36b   : > { %3928 = vmatpush3.bf16.msra.mxu1 %v3903_v53  ;;  %v2205_v53 = vld [vmem:[%s5483_s5 + $0x1c8] sm:$0xff] }
 0x36c   : > { %3929 = vmatprep.subr.bf16.mxu1 %v4221_v5  ;;  %v3986_v45 = vpack.c.bf16 %v2205_v53, %v2204_v52  ;;  %v2177_v52 = vld [vmem:[%s5483_s5 + $0xe8] sm:$0xff] }
 0x36f   : > { %3931 = vmatpush3.bf16.msra.mxu1 %v3906_v43  ;;  %v2189_v43 = vld [vmem:[%s5483_s5 + $0x148] sm:$0xff] }
 0x370   : > { %3932 = vmatprep.subr.bf16.mxu1 %v4221_v5  ;;  %v3988_v55 = vpack.c.bf16 %v2189_v43, %v2188_v54  ;;  %v2161_v43 = vld [vmem:[%s5483_s5 + $0x68] sm:$0xff] }
 0x373   : > { %3934 = vmatpush3.bf16.msra.mxu1 %v3909_v58 }
 0x374   : > { %3935 = vmatprep.subr.bf16.mxu1 %v4221_v5 }
 0x377   : > { %3937 = vmatpush3.bf16.msra.mxu1 %v3912_v60 }
 0x378   : > { %3971 = vmatprep.subr.bf16.mxu1 %v3970_v26  ;;  %v2152_v26 = vld [vmem:[%s5483_s5 + $0x20] sm:$0xff] }
 0x379   : > { %v3948_v31 = vpack.c.bf16 %v2153_v28, %v2152_v26 }
 0x40d   : > { %v2996_v61 = vpop.f32.mrb[16].mxu1 }
 0x40e   : > { %v2997_v62 = vpop.f32.mrb[17].mxu1 }
 0x40f   : > { %v2998_v63 = vadd.f32 %v2997_v62, %v2996_v61 }
 0x415   : > { %v3031_v0 = vpop.f32.mrb[8].mxu0 }
 0x416   : > { %v3032_v1 = vpop.f32.mrb[9].mxu0 }
 0x417   : > { %v3033_v2 = vadd.f32 %v3032_v1, %v3031_v0 }
 0x419   : > { %v1513_v3 = vadd.f32 %v3033_v2, %v2998_v63 }
 0x42d   : > { %v1582_v4 = vpop.f32.mrb[18].mxu1 }
 0x42e   : > { %v5052_v6 = vadd.f32 %v1582_v4, %v1513_v3  ;;  %v3407_v7 = vpop.f32.mrb[19].mxu1 }
 0x42f   : > { %v1773_v7 = vld [vmem:[#allocation4] sm:$0xf] }
 0x430   : > { %v1602_v8 = vrot.slane %v5052_v6, 4  ;;  %v1680_v9 = vmul.f32 %v5052_v6, %v5052_v6 }
 0x432   : > { %v1603_v10 = vadd.f32 %v1602_v8, %v5052_v6  ;;  %v1681_v11 = vrot.slane %v1680_v9, 4  ;;  %v1849_v8 = vld [vmem:[#allocation4 + $0x4] sm:$0xf] }
 0x434   : > { %v1604_v12 = vrot.slane %v1603_v10, 2  ;;  %v1682_v13 = vadd.f32 %v1681_v11, %v1680_v9  ;;  %v2164_v9 = vld [vmem:[%s5483_s5 + $0x80] sm:$0xff]  ;;  %v1999_v11 = vld [vmem:[#allocation4 + $0xc] sm:$0xf] }
 0x436   : > { %v1605_v14 = vadd.f32 %v1604_v12, %v1603_v10  ;;  %v1683_v15 = vrot.slane %v1682_v13, 2  ;;  %v2165_v10 = vld [vmem:[%s5483_s5 + $0x88] sm:$0xff] }
 0x437   : > { %v3938_v12 = vpack.c.bf16 %v2165_v10, %v2164_v9  ;;  %v2193_v9 = vld [vmem:[%s5483_s5 + $0x168] sm:$0xff] }
 0x438   : > { %v1606_v16 = vrot.slane %v1605_v14, 1  ;;  %v1684_v17 = vadd.f32 %v1683_v15, %v1682_v13  ;;  %v2148_v13 = vld [vmem:[%s5483_s5] sm:$0xff]  ;;  %v2166_v15 = vld [vmem:[%s5483_s5 + $0x90] sm:$0xff] }
 0x43a   : > { %v1607_v18 = vadd.f32 %v1606_v16, %v1605_v14  ;;  %v1685_v19 = vrot.slane %v1684_v17, 1  ;;  %v2149_v14 = vld [vmem:[%s5483_s5 + $0x8] sm:$0xff]  ;;  %v2167_v16 = vld [vmem:[%s5483_s5 + $0x98] sm:$0xff] }
 0x43c   : > { %v1609_v20 = vmul.f32 0.125, %v1607_v18  ;;  %v1686_v21 = vadd.f32 %v1685_v19, %v1684_v17  ;;  %v2074_v17 = vld [vmem:[#allocation4 + $0x10] sm:$0xf]  ;;  %v3940_v18 = vpack.c.bf16 %v2149_v14, %v2148_v13  ;;  %v3942_v19 = vpack.c.bf16 %v2167_v16, %v2166_v15  ;;  %v2194_v14 = vld [vmem:[%s5483_s5 + $0x170] sm:$0xff] }
 0x43d   : > { %v2195_v15 = vld [vmem:[%s5483_s5 + $0x178] sm:$0xff] }
 0x43e   : > { %3441 = vmatmul.mubr.f32.vlgmr.msra.gmra.mrb[10].mxu0 %v1609_v20  ;;  %v1687_v22 = vmul.f32 0.125, %v1686_v21  ;;  %v2150_v20 = vld [vmem:[%s5483_s5 + $0x10] sm:$0xff]  ;;  %v2151_v21 = vld [vmem:[%s5483_s5 + $0x18] sm:$0xff]  ;;  %v4000_v16 = vpack.c.bf16 %v2195_v15, %v2194_v14 }
 0x43f   : > { %3480 = vmatprep.mubr.msk.f32.mxu0 %vm4222_vm0, %v4223_v27  ;;  %v3944_v24 = vpack.c.bf16 %v2151_v21, %v2150_v20 }
 0x440   : > { %3476 = vmatmul.mubr.f32.vlgmr.msra.gmra.mrb[20].mxu1 %v1687_v22  ;;  %v2168_v22 = vld [vmem:[%s5483_s5 + $0xa0] sm:$0xff] }
 0x441   : > { %3973 = vmatpush3.bf16.msra.mxu1 %v3972_v29  ;;  %v3946_v25 = vpack.c.bf16 %v2169_v23, %v2168_v22  ;;  %v2170_v29 = vld [vmem:[%s5483_s5 + $0xb0] sm:$0xff] }
 0x442   : > { %3975 = vmatprep.subr.bf16.mxu1 %v3974_v33  ;;  %v3950_v32 = vpack.c.bf16 %v2171_v30, %v2170_v29  ;;  %v2154_v33 = vld [vmem:[%s5483_s5 + $0x30] sm:$0xff]  ;;  %v2216_v29 = vld [vmem:[%s5483_s5 + $0x220] sm:$0xff]  ;;  %v2217_v30 = vld [vmem:[%s5483_s5 + $0x228] sm:$0xff] }
 0x443   : > { %v3952_v38 = vpack.c.bf16 %v2155_v34, %v2154_v33  ;;  %v2214_v23 = vld [vmem:[%s5483_s5 + $0x210] sm:$0xff] }
 0x444   : > { %v2218_v34 = vld [vmem:[%s5483_s5 + $0x230] sm:$0xff] }
 0x445   : > { %3977 = vmatpush3.bf16.msra.mxu1 %v3976_v36  ;;  %v2172_v36 = vld [vmem:[%s5483_s5 + $0xc0] sm:$0xff] }
 0x446   : > { %3979 = vmatprep.subr.bf16.mxu1 %v3978_v40  ;;  %v3954_v39 = vpack.c.bf16 %v2173_v37, %v2172_v36  ;;  %v2156_v40 = vld [vmem:[%s5483_s5 + $0x40] sm:$0xff]  ;;  %v2219_v36 = vld [vmem:[%s5483_s5 + $0x238] sm:$0xff] }
 0x447   : > { %v3956_v47 = vpack.c.bf16 %v2157_v42, %v2156_v40  ;;  %v2221_v40 = vld [vmem:[%s5483_s5 + $0x248] sm:$0xff] }
 0x449   : > { %3981 = vmatpush3.bf16.msra.mxu1 %v3980_v44  ;;  %v2174_v44 = vld [vmem:[%s5483_s5 + $0xd0] sm:$0xff] }
 0x44a   : > { %3983 = vmatprep.subr.bf16.mxu1 %v3982_v49  ;;  %v3958_v48 = vpack.c.bf16 %v2175_v46, %v2174_v44  ;;  %v2158_v49 = vld [vmem:[%s5483_s5 + $0x50] sm:$0xff] }
 0x44b   : > { %v3960_v53 = vpack.c.bf16 %v2159_v50, %v2158_v49  ;;  %v2224_v50 = vld [vmem:[%s5483_s5 + $0x260] sm:$0xff] }
 0x44d   : > { %3985 = vmatpush3.bf16.msra.mxu1 %v3984_v51  ;;  %v2176_v51 = vld [vmem:[%s5483_s5 + $0xe0] sm:$0xff] }
 0x44e   : > { %3987 = vmatprep.subr.bf16.mxu1 %v3986_v45  ;;  %v3962_v54 = vpack.c.bf16 %v2177_v52, %v2176_v51  ;;  %v2160_v45 = vld [vmem:[%s5483_s5 + $0x60] sm:$0xff]  ;;  %v2225_v51 = vld [vmem:[%s5483_s5 + $0x268] sm:$0xff] }
 0x44f   : > { %v4021_v52 = vpack.c.bf16 %v2225_v51, %v2224_v50  ;;  %v2638_v50 = vld [vmem:[%s5487_s9 + $0x10] sm:$0xff] }
 0x451   : > { %3989 = vmatpush3.bf16.msra.mxu1 %v3988_v55  ;;  %v2178_v55 = vld [vmem:[%s5483_s5 + $0xf0] sm:$0xff] }
 0x511   : > { %v1676_v56 = vpop.f32.mrb[10].mxu0 }
 0x512   : > { %v1758_v57 = vmul.f32 %v1676_v56, %v1676_v56  ;;  %v3442_v58 = vpop.f32.mrb[11].mxu0  ;;  %v1763_v63 = vrot.slane %v1676_v56, %v4770_v41  ;;  %v2179_v56 = vld [vmem:[%s5483_s5 + $0xf8] sm:$0xff] }
 0x513   : > { %v1754_v59 = vpop.f32.mrb[20].mxu1  ;;  %v3966_v58 = vpack.c.bf16 %v2179_v56, %v2178_v55  ;;  %v2439_v55 = vld [vmem:[%s5486_s8 + $0x8] sm:$0xff]  ;;  %v2440_v56 = vld [vmem:[%s5486_s8 + $0x10] sm:$0xff] }
 0x514   : > { %v1759_v60 = vsub.f32 %v1754_v59, %v1758_v57  ;;  %v3477_v61 = vpop.f32.mrb[21].mxu1  ;;  %v1764_v1 = vsub.f32 %v5052_v6, %v1763_v63  ;;  %v1924_v6 = vld [vmem:[#allocation4 + $0x8] sm:$0xf]  ;;  %v3964_v57 = vpack.c.bf16 %v2161_v43, %v2160_v45  ;;  %v2207_v63 = vld [vmem:[%s5483_s5 + $0x1d8] sm:$0xff]  ;;  %v2438_v43 = vld [vmem:[%s5486_s8] sm:$0xff] }
 0x515   : > { %v2162_v59 = vld [vmem:[%s5483_s5 + $0x70] sm:$0xff] }
 0x516   : > { %v1765_v62 = vadd.f32 1e-05, %v1759_v60  ;;  %v2163_v60 = vld [vmem:[%s5483_s5 + $0x78] sm:$0xff]  ;;  %v2206_v61 = vld [vmem:[%s5483_s5 + $0x1d0] sm:$0xff] }
 0x518   : > { %4137 = vrsqrt.f32 %v1765_v62  ;;  %v3968_v62 = vpack.c.bf16 %v2163_v60, %v2162_v59  ;;  %v2442_v60 = vld [vmem:[%s5486_s8 + $0x20] sm:$0xff] }
 0x522   : > { %v4138_v0 = vpop.eup %4137 }
 0x523   : > { %v1770_v2 = vrot.slane %v4138_v0, %v4770_v41  ;;  %v2190_v0 = vld [vmem:[%s5483_s5 + $0x150] sm:$0xff] }
 0x525   : > { %v1771_v3 = vmul.f32 %v1770_v2, %v1764_v1  ;;  %v2191_v1 = vld [vmem:[%s5483_s5 + $0x158] sm:$0xff]  ;;  %v3990_v2 = vpack.c.bf16 %v2207_v63, %v2206_v61  ;;  %v2443_v61 = vld [vmem:[%s5486_s8 + $0x28] sm:$0xff]  ;;  %v2444_v63 = vld [vmem:[%s5486_s8 + $0x30] sm:$0xff] }
 0x527   : > { %v1772_v4 = vmax.f32 %v1771_v3, 0.0  ;;  %v3992_v3 = vpack.c.bf16 %v2191_v1, %v2190_v0  ;;  %3991 = vmatprep.subr.bf16.mxu1 %v3990_v2  ;;  %v2445_v0 = vld [vmem:[%s5486_s8 + $0x38] sm:$0xff]  ;;  %v2446_v2 = vld [vmem:[%s5486_s8 + $0x40] sm:$0xff] }
 0x528   : > { %v4036_v1 = vpack.c.bf16 %v2445_v0, %v2444_v63  ;;  %v2649_v63 = vld [vmem:[%s5487_s9 + $0x68] sm:$0xff] }
 0x529   : > { %3479 = vmatpush3.msra.mxu0 %v1772_v4  ;;  %3993 = vmatpush3.bf16.msra.mxu1 %v3992_v3  ;;  %v2447_v3 = vld [vmem:[%s5486_s8 + $0x48] sm:$0xff] }
 0x52a   : > { %3481 = vmatmul.mubr.msk.f32.vlgmr.msra.gmra.mrb[12].mxu0 %vm1774_vm2, %v1773_v7  ;;  %3483 = vmatprep.subr.mxu0 %v4223_v27  ;;  %v2209_v7 = vld [vmem:[%s5483_s5 + $0x1e8] sm:$0xff] }
 0x52b   : > { %3484 = vmatpush3.msra.mxu0 %v1772_v4  ;;  %3485 = vmatprep.mubr.msk.f32.mxu0 %vm4222_vm0, %v4223_v27 }
 0x52c   : > { %3488 = vmatprep.subr.mxu0 %v4223_v27 }
 0x52e   : > { %3486 = vmatmul.mubr.msk.f32.vlgmr.msra.gmra.mrb[14].mxu0 %vm1774_vm2, %v1849_v8 }
 0x52f   : > { %3489 = vmatpush3.msra.mxu0 %v1772_v4  ;;  %3490 = vmatprep.mubr.msk.f32.mxu0 %vm4222_vm0, %v4223_v27 }
 0x530   : > { %3493 = vmatprep.subr.mxu0 %v4223_v27 }
 0x532   : > { %3491 = vmatmul.mubr.msk.f32.vlgmr.msra.gmra.mrb[16].mxu0 %vm1774_vm2, %v1924_v6  ;;  %v2192_v6 = vld [vmem:[%s5483_s5 + $0x160] sm:$0xff] }
 0x533   : > { %3494 = vmatpush3.msra.mxu0 %v1772_v4  ;;  %3495 = vmatprep.mubr.msk.f32.mxu0 %vm4222_vm0, %v4223_v27  ;;  %v3996_v10 = vpack.c.bf16 %v2193_v9, %v2192_v6  ;;  %v2450_v9 = vld [vmem:[%s5486_s8 + $0x60] sm:$0xff] }
 0x534   : > { %3498 = vmatprep.subr.mxu0 %v4223_v27 }
 0x536   : > { %3496 = vmatmul.mubr.msk.f32.vlgmr.msra.gmra.mrb[18].mxu0 %vm1774_vm2, %v1999_v11  ;;  %v2210_v11 = vld [vmem:[%s5483_s5 + $0x1f0] sm:$0xff] }
 0x537   : > { %3499 = vmatpush3.msra.mxu0 %v1772_v4  ;;  %3500 = vmatprep.mubr.msk.f32.mxu0 %vm4222_vm0, %v4223_v27  ;;  %v2208_v4 = vld [vmem:[%s5483_s5 + $0x1e0] sm:$0xff] }
 0x538   : > { %3939 = vmatprep.subr.bf16.mxu0 %v3938_v12  ;;  %v3994_v8 = vpack.c.bf16 %v2209_v7, %v2208_v4  ;;  %v2211_v12 = vld [vmem:[%s5483_s5 + $0x1f8] sm:$0xff]  ;;  %v4039_v4 = vpack.c.bf16 %v2447_v3, %v2446_v2  ;;  %v2448_v7 = vld [vmem:[%s5486_s8 + $0x50] sm:$0xff] }
 0x539   : > { %v3998_v13 = vpack.c.bf16 %v2211_v12, %v2210_v11  ;;  %v2452_v12 = vld [vmem:[%s5486_s8 + $0x70] sm:$0xff]  ;;  %v2651_v2 = vld [vmem:[%s5487_s9 + $0x78] sm:$0xff] }
 0x53a   : > { %3501 = vmatmul.mubr.msk.f32.vlgmr.msra.gmra.mrb[20].mxu0 %vm1774_vm2, %v2074_v17  ;;  %3995 = vmatprep.subr.bf16.mxu1 %v3994_v8  ;;  %v2449_v8 = vld [vmem:[%s5486_s8 + $0x58] sm:$0xff] }
 0x53b   : > { %3941 = vmatpush3.bf16.msra.mxu0 %v3940_v18  ;;  %3997 = vmatpush3.bf16.msra.mxu1 %v3996_v10  ;;  %v2212_v18 = vld [vmem:[%s5483_s5 + $0x200] sm:$0xff]  ;;  %v4042_v6 = vpack.c.bf16 %v2449_v8, %v2448_v7  ;;  %v2451_v10 = vld [vmem:[%s5486_s8 + $0x68] sm:$0xff] }
 0x53c   : > { %3943 = vmatprep.subr.bf16.mxu0 %v3942_v19  ;;  %3999 = vmatprep.subr.bf16.mxu1 %v3998_v13  ;;  %v2213_v19 = vld [vmem:[%s5483_s5 + $0x208] sm:$0xff]  ;;  %v4045_v11 = vpack.c.bf16 %v2451_v10, %v2450_v9  ;;  %v2453_v13 = vld [vmem:[%s5486_s8 + $0x78] sm:$0xff] }
 0x53d   : > { %v4003_v21 = vpack.c.bf16 %v2213_v19, %v2212_v18  ;;  %v4048_v14 = vpack.c.bf16 %v2453_v13, %v2452_v12 }
 0x53f   : > { %3945 = vmatpush3.bf16.msra.mxu0 %v3944_v24  ;;  %4001 = vmatpush3.bf16.msra.mxu1 %v4000_v16  ;;  %v2215_v24 = vld [vmem:[%s5483_s5 + $0x218] sm:$0xff] }
 0x540   : > { %3947 = vmatprep.subr.bf16.mxu0 %v3946_v25  ;;  %4026 = vmatprep.subr.bf16.mxu1 %v4221_v5  ;;  %v4006_v26 = vpack.c.bf16 %v2215_v24, %v2214_v23 }
 0x543   : > { %3949 = vmatpush3.bf16.msra.mxu0 %v3948_v31 }
 0x544   : > { %3951 = vmatprep.subr.bf16.mxu0 %v3950_v32  ;;  %v4009_v32 = vpack.c.bf16 %v2217_v30, %v2216_v29 }
 0x547   : > { %3953 = vmatpush3.bf16.msra.mxu0 %v3952_v38  ;;  %v4012_v38 = vpack.c.bf16 %v2219_v36, %v2218_v34 }
 0x548   : > { %3955 = vmatprep.subr.bf16.mxu0 %v3954_v39  ;;  %v2220_v39 = vld [vmem:[%s5483_s5 + $0x240] sm:$0xff] }
 0x549   : > { %v4015_v46 = vpack.c.bf16 %v2221_v40, %v2220_v39 }
 0x54b   : > { %3957 = vmatpush3.bf16.msra.mxu0 %v3956_v47  ;;  %v2222_v47 = vld [vmem:[%s5483_s5 + $0x250] sm:$0xff] }
 0x54c   : > { %3959 = vmatprep.subr.bf16.mxu0 %v3958_v48  ;;  %v2223_v48 = vld [vmem:[%s5483_s5 + $0x258] sm:$0xff] }
 0x54d   : > { %v4018_v49 = vpack.c.bf16 %v2223_v48, %v2222_v47  ;;  %v2636_v47 = vld [vmem:[%s5487_s9] sm:$0xff]  ;;  %v2637_v48 = vld [vmem:[%s5487_s9 + $0x8] sm:$0xff] }
 0x54f   : > { %3961 = vmatpush3.bf16.msra.mxu0 %v3960_v53  ;;  %v2226_v53 = vld [vmem:[%s5483_s5 + $0x270] sm:$0xff] }
 0x550   : > { %3963 = vmatprep.subr.bf16.mxu0 %v3962_v54  ;;  %v2227_v54 = vld [vmem:[%s5483_s5 + $0x278] sm:$0xff] }
 0x551   : > { %v4024_v45 = vpack.c.bf16 %v2227_v54, %v2226_v53  ;;  %v2641_v53 = vld [vmem:[%s5487_s9 + $0x28] sm:$0xff] }
 0x553   : > { %3965 = vmatpush3.bf16.msra.mxu0 %v3964_v57  ;;  %v4027_v57 = vpack.c.bf16 %v2439_v55, %v2438_v43  ;;  %v2643_v43 = vld [vmem:[%s5487_s9 + $0x38] sm:$0xff] }
 0x554   : > { %3967 = vmatprep.subr.bf16.mxu0 %v3966_v58  ;;  %v2441_v58 = vld [vmem:[%s5486_s8 + $0x18] sm:$0xff] }
 0x555   : > { %v4030_v59 = vpack.c.bf16 %v2441_v58, %v2440_v56  ;;  %v2644_v56 = vld [vmem:[%s5487_s9 + $0x40] sm:$0xff] }
 0x557   : > { %3969 = vmatpush3.bf16.msra.mxu0 %v3968_v62  ;;  %v4033_v62 = vpack.c.bf16 %v2443_v61, %v2442_v60  ;;  %v2647_v60 = vld [vmem:[%s5487_s9 + $0x58] sm:$0xff] }
 0x558   : > { %4002 = vmatprep.subr.bf16.mxu0 %v4221_v5 }
 0x5fd   : > { %v1844_v17 = vpop.f32.mrb[12].mxu0 }
 0x5fe   : > { %v3482_v20 = vpop.f32.mrb[13].mxu0 }
 0x601   : > { %v1919_v22 = vpop.f32.mrb[14].mxu0 }
 0x602   : > { %2292 = vmatprep.mubr.f32.mxu0 %v1919_v22  ;;  %v3487_v25 = vpop.f32.mrb[15].mxu0 }
 0x603   : > { %2293 = vmatmul.mubr.f32.vlgmr.msra.gmra.mrb[22].mxu0 %v1844_v17 }
 0x604   : > { %4004 = vmatpush3.bf16.msra.mxu0 %v4003_v21  ;;  %3535 = vmatprep.mubr.msk.f32.mxu0 %vm4222_vm0, %v4223_v27 }
 0x605   : > { %4005 = vmatprep.subr.bf16.mxu0 %v4221_v5  ;;  %v1994_v28 = vpop.f32.mrb[16].mxu0 }
 0x606   : > { %v3492_v31 = vpop.f32.mrb[17].mxu0 }
 0x608   : > { %4007 = vmatpush3.bf16.msra.mxu0 %v4006_v26 }
 0x609   : > { %v2069_v33 = vpop.f32.mrb[18].mxu0  ;;  %4008 = vmatprep.subr.bf16.mxu0 %v4221_v5 }
 0x60a   : > { %2362 = vmatprep.mubr.f32.mxu1 %v2069_v33  ;;  %v3497_v37 = vpop.f32.mrb[19].mxu0 }
 0x60b   : > { %2363 = vmatmul.mubr.f32.vlgmr.msra.gmra.mrb[22].mxu1 %v1994_v28 }
 0x60c   : > { %4010 = vmatpush3.bf16.msra.mxu0 %v4009_v32  ;;  %3570 = vmatprep.mubr.msk.f32.mxu1 %vm4222_vm0, %v4223_v27 }
 0x60d   : > { %4011 = vmatprep.subr.bf16.mxu0 %v4221_v5  ;;  %v2144_v42 = vpop.f32.mrb[20].mxu0  ;;  %4028 = vmatpush3.bf16.msra.mxu1 %v4027_v57 }
 0x60e   : > { %v3502_v44 = vpop.f32.mrb[21].mxu0  ;;  %4029 = vmatprep.subr.bf16.mxu1 %v4221_v5 }
 0x610   : > { %4013 = vmatpush3.bf16.msra.mxu0 %v4012_v38 }
 0x611   : > { %4014 = vmatprep.subr.bf16.mxu0 %v4221_v5  ;;  %4031 = vmatpush3.bf16.msra.mxu1 %v4030_v59 }
 0x612   : > { %4032 = vmatprep.subr.bf16.mxu1 %v4221_v5 }
 0x614   : > { %4016 = vmatpush3.bf16.msra.mxu0 %v4015_v46 }
 0x615   : > { %4017 = vmatprep.subr.bf16.mxu0 %v4221_v5  ;;  %4034 = vmatpush3.bf16.msra.mxu1 %v4033_v62 }
 0x616   : > { %4035 = vmatprep.subr.bf16.mxu1 %v4221_v5 }
 0x618   : > { %4019 = vmatpush3.bf16.msra.mxu0 %v4018_v49  ;;  %v4075_v49 = vpack.c.bf16 %v2637_v48, %v2636_v47 }
 0x619   : > { %4020 = vmatprep.subr.bf16.mxu0 %v4221_v5  ;;  %4037 = vmatpush3.bf16.msra.mxu1 %v4036_v1 }
 0x61a   : > { %4038 = vmatprep.subr.bf16.mxu1 %v4221_v5 }
 0x61c   : > { %4022 = vmatpush3.bf16.msra.mxu0 %v4021_v52  ;;  %v2640_v52 = vld [vmem:[%s5487_s9 + $0x20] sm:$0xff] }
 0x61d   : > { %4023 = vmatprep.subr.bf16.mxu0 %v4221_v5  ;;  %4040 = vmatpush3.bf16.msra.mxu1 %v4039_v4  ;;  %v4081_v54 = vpack.c.bf16 %v2641_v53, %v2640_v52 }
 0x61e   : > { %4041 = vmatprep.subr.bf16.mxu1 %v4221_v5 }
 0x620   : > { %4025 = vmatpush3.bf16.msra.mxu0 %v4024_v45  ;;  %v2642_v45 = vld [vmem:[%s5487_s9 + $0x30] sm:$0xff] }
 0x621   : > { %4050 = vmatprep.subr.bf16.mxu0 %v4221_v5  ;;  %4043 = vmatpush3.bf16.msra.mxu1 %v4042_v6  ;;  %v4084_v55 = vpack.c.bf16 %v2643_v43, %v2642_v45 }
 0x622   : > { %4044 = vmatprep.subr.bf16.mxu1 %v4221_v5 }
 0x623   : > { %3536 = vmatmul.mubr.f32.vlgmr.msra.gmra.mrb[24].mxu0 %v2144_v42 }
 0x624   : > { %3605 = vmatprep.mubr.msk.f32.mxu0 %vm4222_vm0, %v4223_v27  ;;  %4052 = vmatpush3.bf16.msra.mxu0 %v4027_v57  ;;  %v2645_v57 = vld [vmem:[%s5487_s9 + $0x48] sm:$0xff] }
 0x625   : > { %4053 = vmatprep.subr.bf16.mxu0 %v4221_v5  ;;  %4046 = vmatpush3.bf16.msra.mxu1 %v4045_v11  ;;  %v4087_v58 = vpack.c.bf16 %v2645_v57, %v2644_v56 }
 0x626   : > { %4047 = vmatprep.subr.bf16.mxu1 %v4221_v5 }
 0x628   : > { %4055 = vmatpush3.bf16.msra.mxu0 %v4030_v59  ;;  %v2646_v59 = vld [vmem:[%s5487_s9 + $0x50] sm:$0xff] }
 0x629   : > { %4056 = vmatprep.subr.bf16.mxu0 %v4221_v5  ;;  %4049 = vmatpush3.bf16.msra.mxu1 %v4048_v14  ;;  %v4090_v61 = vpack.c.bf16 %v2647_v60, %v2646_v59 }
 0x62a   : > { %4074 = vmatprep.subr.bf16.mxu1 %v4221_v5 }
 0x62c   : > { %4058 = vmatpush3.bf16.msra.mxu0 %v4033_v62  ;;  %v2648_v62 = vld [vmem:[%s5487_s9 + $0x60] sm:$0xff] }
 0x62d   : > { %4059 = vmatprep.subr.bf16.mxu0 %v4221_v5  ;;  %v4093_v0 = vpack.c.bf16 %v2649_v63, %v2648_v62 }
 0x630   : > { %4061 = vmatpush3.bf16.msra.mxu0 %v4036_v1  ;;  %v2650_v1 = vld [vmem:[%s5487_s9 + $0x70] sm:$0xff] }
 0x631   : > { %4062 = vmatprep.subr.bf16.mxu0 %v4221_v5  ;;  %v4096_v3 = vpack.c.bf16 %v2651_v2, %v2650_v1 }
 0x634   : > { %4064 = vmatpush3.bf16.msra.mxu0 %v4039_v4 }
 0x635   : > { %4065 = vmatprep.subr.bf16.mxu0 %v4221_v5 }
 0x638   : > { %4067 = vmatpush3.bf16.msra.mxu0 %v4042_v6 }
 0x639   : > { %4068 = vmatprep.subr.bf16.mxu0 %v4221_v5 }
 0x63c   : > { %4070 = vmatpush3.bf16.msra.mxu0 %v4045_v11 }
 0x63d   : > { %4071 = vmatprep.subr.bf16.mxu0 %v4221_v5 }
 0x640   : > { %4073 = vmatpush3.bf16.msra.mxu0 %v4048_v14 }
 0x6d6   : > { %v3127_v15 = vpop.f32.mrb[22].mxu0 }
 0x6d7   : > { %v3128_v16 = vpop.f32.mrb[23].mxu0 }
 0x6d8   : > { %v3129_v17 = vadd.f32 %v3128_v16, %v3127_v15 }
 0x6de   : > { %v3162_v18 = vpop.f32.mrb[22].mxu1 }
 0x6df   : > { %v3163_v19 = vpop.f32.mrb[23].mxu1 }
 0x6e0   : > { %v3164_v20 = vadd.f32 %v3163_v19, %v3162_v18 }
 0x6e2   : > { %v2365_v21 = vadd.f32 %v3164_v20, %v3129_v17 }
 0x6f6   : > { %v2434_v22 = vpop.f32.mrb[24].mxu0 }
 0x6f7   : > { %v5399_v23 = vadd.f32 %v2434_v22, %v2365_v21  ;;  %v3537_v24 = vpop.f32.mrb[25].mxu0 }
 0x6f9   : > { %v2455_v25 = vsel %vm2454_vm3, %v5399_v23, 0.0  ;;  %v2534_v26 = vmul.f32 %v5399_v23, %v5399_v23 }
 0x6fa   : > { %v2456_v28 = vrot.slane %v2455_v25, 4 }
 0x6fb   : > { %v2535_v29 = vsel %vm2454_vm3, %v2534_v26, 0.0  ;;  %v2652_v26 = vld [vmem:[%s5488_s10] sm:$0x1] }
 0x6fc   : > { %v2457_v30 = vadd.f32 %v2456_v28, %v2455_v25  ;;  %v2536_v31 = vrot.slane %v2535_v29, 4 }
 0x6fe   : > { %v2458_v32 = vrot.slane %v2457_v30, 2  ;;  %v2537_v33 = vadd.f32 %v2536_v31, %v2535_v29  ;;  %v2724_v29 = vand.u32 127, %v905_v35 }
 0x700   : > { %v2459_v34 = vadd.f32 %v2458_v32, %v2457_v30  ;;  %v2538_v36 = vrot.slane %v2537_v33, 2  ;;  %vm2725_vm4 = vcmp.lt.s32.totalorder %v2724_v29, 16 }
 0x702   : > { %v2460_v37 = vrot.slane %v2459_v34, 1  ;;  %v2539_v38 = vadd.f32 %v2538_v36, %v2537_v33 }
 0x704   : > { %v2461_v39 = vadd.f32 %v2460_v37, %v2459_v34  ;;  %v2540_v40 = vrot.slane %v2539_v38, 1 }
 0x706   : > { %v2463_v42 = vmul.f32 0.25, %v2461_v39  ;;  %v2541_v44 = vadd.f32 %v2540_v40, %v2539_v38 }
 0x708   : > { %3571 = vmatmul.mubr.f32.vlgmr.msra.gmra.mrb[24].mxu1 %v2463_v42  ;;  %v2542_v46 = vmul.f32 0.25, %v2541_v44 }
 0x709   : > { %3640 = vmatprep.mubr.msk.f32.mxu1 %vm4222_vm0, %v4223_v27  ;;  %4076 = vmatpush3.bf16.msra.mxu1 %v4075_v49  ;;  %v2639_v27 = vld [vmem:[%s5487_s9 + $0x18] sm:$0xff] }
 0x70a   : > { %3606 = vmatmul.mubr.f32.vlgmr.msra.gmra.mrb[26].mxu0 %v2542_v46  ;;  %4077 = vmatprep.subr.bf16.mxu1 %v4221_v5  ;;  %v4078_v51 = vpack.c.bf16 %v2639_v27, %v2638_v50 }
 0x70d   : > { %4079 = vmatpush3.bf16.msra.mxu1 %v4078_v51 }
 0x70e   : > { %4080 = vmatprep.subr.bf16.mxu1 %v4221_v5 }
 0x711   : > { %4082 = vmatpush3.bf16.msra.mxu1 %v4081_v54 }
 0x712   : > { %4083 = vmatprep.subr.bf16.mxu1 %v4221_v5 }
 0x715   : > { %4085 = vmatpush3.bf16.msra.mxu1 %v4084_v55 }
 0x716   : > { %4086 = vmatprep.subr.bf16.mxu1 %v4221_v5 }
 0x719   : > { %4088 = vmatpush3.bf16.msra.mxu1 %v4087_v58 }
 0x71a   : > { %4089 = vmatprep.subr.bf16.mxu1 %v4221_v5 }
 0x71d   : > { %4091 = vmatpush3.bf16.msra.mxu1 %v4090_v61 }
 0x71e   : > { %4092 = vmatprep.subr.bf16.mxu1 %v4221_v5 }
 0x721   : > { %4094 = vmatpush3.bf16.msra.mxu1 %v4093_v0 }
 0x722   : > { %4095 = vmatprep.subr.bf16.mxu1 %v4221_v5 }
 0x725   : > { %4097 = vmatpush3.bf16.msra.mxu1 %v4096_v3 }
 0x7db   : > { %v2530_v4 = vpop.f32.mrb[24].mxu1 }
 0x7dc   : > { %v2613_v7 = vmul.f32 %v2530_v4, %v2530_v4  ;;  %v3572_v8 = vpop.f32.mrb[25].mxu1  ;;  %v2618_v12 = vrot.slane %v2530_v4, %v4770_v41 }
 0x7dd   : > { %v2609_v6 = vpop.f32.mrb[26].mxu0 }
 0x7de   : > { %v2614_v9 = vsub.f32 %v2609_v6, %v2613_v7  ;;  %v3607_v10 = vpop.f32.mrb[27].mxu0  ;;  %v2619_v14 = vsub.f32 %v5399_v23, %v2618_v12 }
 0x7e0   : > { %v2620_v11 = vadd.f32 1e-05, %v2614_v9 }
 0x7e2   : > { %4139 = vrsqrt.f32 %v2620_v11 }
 0x7ec   : > { %v4140_v13 = vpop.eup %4139 }
 0x7ed   : > { %v2625_v15 = vrot.slane %v4140_v13, %v4770_v41 }
 0x7ef   : > { %v2626_v16 = vmul.f32 %v2625_v15, %v2619_v14 }
 0x7f1   : > { %v2627_v17 = vmax.f32 %v2626_v16, 0.0 }
 0x7f3   : > { %v2628_v5 = vsel %vm2454_vm3, %v2627_v17, 0.0 }
 0x7f4   : > { %v2629_v18 = vrot.slane %v2628_v5, 4 }
 0x7f6   : > { %v2630_v19 = vadd.f32 %v2629_v18, %v2628_v5 }
 0x7f8   : > { %v2631_v20 = vrot.slane %v2630_v19, 2 }
 0x7fa   : > { %v2632_v21 = vadd.f32 %v2631_v20, %v2630_v19 }
 0x7fc   : > { %v2633_v22 = vrot.slane %v2632_v21, 1 }
 0x7fe   : > { %v2634_v24 = vadd.f32 %v2633_v22, %v2632_v21 }
 0x800   : > { %v2635_v25 = vmul.f32 0.25, %v2634_v24 }
 0x802   : > { %3641 = vmatmul.mubr.f32.vlgmr.msra.gmra.mrb[26].mxu1 %v2635_v25 }
 0x8d5   : > { %v2719_v23 = vpop.f32.mrb[26].mxu1 }
 0x8d6   : > { %v2720_v28 = vadd.f32 %v2719_v23, %v2652_v26  ;;  %v3642_v41 = vpop.f32.mrb[27].mxu1 }
 0x8d8   : > { %4141 = vtanh.f32 %v2720_v28 }
 0x8e2   : > { %v4142_v30 = vpop.eup %4141 }
 0x8e3   : > { %v2727_v31 = vsel %vm2725_vm4, %v4142_v30, %v2720_v28 }
 0x8e4   : > { %2729 = vst.msk [vmem:[%s412_s27] sm:$0x1] %vm2728_vm5, %v2727_v31 }
 0x8e5 PF: > { %s23_s17 = sadd.s32 1, %s4213_s17  }
 0x8e6   : > { %p20_p9 = scmp.ge.s32.totalorder %s23_s17, 4  }
 0x8e8   :  { %22 = sbr.rel (!%p20_p9) target bundleno = 2 (0x2), region = 111 }
 0x8ef   :  { %2747 = vsyncpa [#allocation3], 1 }
 0x8f0   :  { %2749 = vsyncpa [#allocation3 + $0x1], 1 }
 0x8f1   :  { %2750 = vsyncpa [#allocation5], 1 }

</bundles_post_ra>
